<compile_context>
chip_gen: v5e
topology: v5e:2x2
jax: 0.10.0
libtpu: 0.0.40
codegen_flags: <defaults>
</compile_context>

<pallas_src>
import functools

import jax
import jax.numpy as jnp
from jax.experimental import pallas as pl
from jax.experimental.pallas import tpu as pltpu

# ---- model config (matches module __init__ structure; small demo sizes) ----
MSA_CH = 64           # msa_channel
NUM_CH = 32           # config.num_channel
NUM_BLOCKS = 2        # config.num_residual_block
N_TORSIONS = 7        # 7 torsion angles, (sin, cos) each
EPS = 1e-12

IN_ROWS = 2 * MSA_CH                                           # fused input K dim
N_MATS_ROWS = IN_ROWS + NUM_BLOCKS * 2 * NUM_CH + 2 * NUM_CH   # weight blob rows
N_BIAS_ROWS = 1 + 2 * NUM_BLOCKS + 2                           # bias blob rows


def sidechain_kernel(rep_ref, w_ref, b_ref, us_ref, uc_ref, ns_ref, nc_ref):
    """One residue tile: fused input proj -> residual MLP -> split angle heads."""

    def relu_bf16(x):
        # relu is exact in any precision; cast to bf16 only for the MXU operands.
        return jnp.maximum(x, 0.0).astype(jnp.bfloat16)

    def dense(x_bf16, w_row, n_rows, b_row):
        # Static, sublane-aligned slice of the resident weight blob; bf16 MXU
        # inputs, f32 accumulation, f32 bias add.
        w = w_ref[w_row:w_row + n_rows, :]
        return (jnp.dot(x_bf16, w, preferred_element_type=jnp.float32)
                + b_ref[b_row])

    # Fused input projection: relu(concat(rep0, rep1)) @ [w_in0; w_in1] + (b0+b1).
    act = dense(relu_bf16(rep_ref[...]), 0, IN_ROWS, 0)

    # Residual blocks (small static unroll).
    w_row, b_row = IN_ROWS, 1
    for _ in range(NUM_BLOCKS):
        h = dense(relu_bf16(act), w_row, NUM_CH, b_row)
        h = dense(relu_bf16(h), w_row + NUM_CH, NUM_CH, b_row + 1)
        act = act + h
        w_row += 2 * NUM_CH
        b_row += 2

    # Angle head, split into sin / cos matmuls so the (sin, cos) pair sum is
    # purely element-wise (no pairing matmul, no lane crossing).
    a = relu_bf16(act)                                   # hoisted, reused twice
    ua_sin = dense(a, w_row, NUM_CH, b_row)              # lanes 0..6 valid
    ua_cos = dense(a, w_row + NUM_CH, NUM_CH, b_row + 1)

    us_ref[...] = ua_sin
    uc_ref[...] = ua_cos

    # l2_normalize over each (sin, cos) pair.
    inv = jax.lax.rsqrt(jnp.maximum(ua_sin * ua_sin + ua_cos * ua_cos, EPS))
    ns_ref[...] = ua_sin * inv
    nc_ref[...] = ua_cos * inv


def pack_params(params):
    """Packs the per-layer weights/biases into one bf16 blob + one f32 blob."""
    (w_in0, b_in0, w_in1, b_in1, w_r1, b_r1, w_r2, b_r2, w_ang, b_ang) = params

    def pad_cols(x):
        return jnp.pad(x, ((0, 0), (0, NUM_CH - x.shape[1])))

    w_rows = [jnp.concatenate([w_in0, w_in1], axis=0)]   # fused input projection
    b_rows = [b_in0 + b_in1]
    for i in range(NUM_BLOCKS):
        w_rows += [w_r1[i], w_r2[i]]
        b_rows += [b_r1[i], b_r2[i]]
    # Angle head split into even (sin) / odd (cos) columns, zero-padded to NUM_CH.
    w_rows += [pad_cols(w_ang[:, 0::2]), pad_cols(w_ang[:, 1::2])]
    b_rows += [pad_cols(b_ang[:, 0::2]), pad_cols(b_ang[:, 1::2])]

    w_blob = jnp.concatenate(w_rows, axis=0).astype(jnp.bfloat16)
    b_blob = jnp.stack(b_rows, axis=0).astype(jnp.float32)
    assert w_blob.shape == (N_MATS_ROWS, NUM_CH)
    assert b_blob.shape == (N_BIAS_ROWS, 1, NUM_CH)
    return w_blob, b_blob


def multi_rigid_sidechain(rep0, rep1, packed_params, affine=None, aatype=None,
                          *, tile_r=256):
    """Angle path of MultiRigidSidechain, one Pallas kernel over residue tiles."""
    del affine, aatype  # TODO(synk): external r3 / all_atom geometry not implemented
    w_blob, b_blob = packed_params
    n_res = rep0.shape[0]

    # Fused input: relu is applied inside the kernel (relu(concat) == concat(relu)).
    rep = jnp.concatenate([rep0, rep1], axis=-1).astype(jnp.bfloat16)

    tile_r = min(tile_r, pl.cdiv(n_res, 8) * 8)
    tile_r = max(8, (tile_r // 8) * 8)               # sublane-aligned residue tile
    n_pad = pl.cdiv(n_res, tile_r) * tile_r
    if n_pad != n_res:
        rep = jnp.pad(rep, ((0, n_pad - n_res), (0, 0)))
    grid = (n_pad // tile_r,)

    row_spec = pl.BlockSpec((tile_r, IN_ROWS), lambda r: (r, 0))
    out_spec = pl.BlockSpec((tile_r, NUM_CH), lambda r: (r, 0))
    out_sds = jax.ShapeDtypeStruct((n_pad, NUM_CH), jnp.float32)

    us, uc, ns, nc = pl.pallas_call(
        sidechain_kernel,
        out_shape=(out_sds,) * 4,
        grid=grid,
        in_specs=[
            row_spec,                                                   # residue tile
            pl.BlockSpec((N_MATS_ROWS, NUM_CH), lambda r: (0, 0)),      # resident weights
            pl.BlockSpec((N_BIAS_ROWS, 1, NUM_CH), lambda r: (0, 0, 0)),  # resident biases
        ],
        out_specs=(out_spec,) * 4,
        compiler_params=pltpu.CompilerParams(
            dimension_semantics=("parallel",)),
    )(rep, w_blob, b_blob)

    def interleave(sin, cos):
        return jnp.stack(
            [sin[:n_res, :N_TORSIONS], cos[:n_res, :N_TORSIONS]], axis=-1)

    return {
        "angles_sin_cos": interleave(ns, nc),
        "unnormalized_angles_sin_cos": interleave(us, uc),
        # TODO(synk): 'frames' and 'atom_pos' require external r3/all_atom modules.
    }


def init_params(key):
    ks = jax.random.split(key, 14)

    def lin(k, fan_in, fan_out):
        return jax.random.normal(k, (fan_in, fan_out), jnp.float32) / jnp.sqrt(fan_in)

    def bias(k, fan_out):
        return 0.1 * jax.random.normal(k, (1, fan_out), jnp.float32)

    w_in0, b_in0 = lin(ks[0], MSA_CH, NUM_CH), bias(ks[1], NUM_CH)
    w_in1, b_in1 = lin(ks[2], MSA_CH, NUM_CH), bias(ks[3], NUM_CH)
    w_r1 = jnp.stack([lin(ks[4 + i], NUM_CH, NUM_CH) for i in range(NUM_BLOCKS)])
    b_r1 = jnp.stack([bias(ks[6 + i], NUM_CH) for i in range(NUM_BLOCKS)])
    w_r2 = jnp.stack([lin(ks[8 + i], NUM_CH, NUM_CH) for i in range(NUM_BLOCKS)])
    b_r2 = jnp.stack([bias(ks[10 + i], NUM_CH) for i in range(NUM_BLOCKS)])
    w_ang = lin(ks[12], NUM_CH, 2 * N_TORSIONS)
    b_ang = bias(ks[13], 2 * N_TORSIONS)
    return (w_in0, b_in0, w_in1, b_in1, w_r1, b_r1, w_r2, b_r2, w_ang, b_ang)


def ref_forward(rep0, rep1, params):
    """Pure-JAX reference mirroring the torch forward (angle path) with the same
    bf16-matmul-input / f32-accumulate precision policy as the kernel."""
    (w_in0, b_in0, w_in1, b_in1, w_r1, b_r1, w_r2, b_r2, w_ang, b_ang) = params

    def dense(x, w, b):
        return jnp.dot(x.astype(jnp.bfloat16), w.astype(jnp.bfloat16),
                       preferred_element_type=jnp.float32) + b

    act = (dense(jnp.maximum(rep0, 0.0), w_in0, b_in0)
           + dense(jnp.maximum(rep1, 0.0), w_in1, b_in1))
    for i in range(NUM_BLOCKS):
        old = act
        h = dense(jnp.maximum(act, 0.0), w_r1[i], b_r1[i])
        h = dense(jnp.maximum(h, 0.0), w_r2[i], b_r2[i])
        act = h + old
    ua = dense(jnp.maximum(act, 0.0), w_ang, b_ang).reshape(-1, N_TORSIONS, 2)
    denom = jnp.sqrt(jnp.clip(jnp.sum(ua * ua, -1, keepdims=True), EPS, None))
    return ua, ua / denom, denom


if __name__ == "__main__":
    N_RES = 200   # pads to 2 residue tiles of 128
    key = jax.random.PRNGKey(0)
    k_p, k_r0, k_r1, k_aa = jax.random.split(key, 4)

    params = init_params(k_p)
    packed = pack_params(params)
    rep0 = jax.random.normal(k_r0, (N_RES, MSA_CH), jnp.float32)
    rep1 = jax.random.normal(k_r1, (N_RES, MSA_CH), jnp.float32)
    aatype = jax.random.randint(k_aa, (N_RES,), 0, 20)   # unused (see TODO)

    fwd = jax.jit(functools.partial(multi_rigid_sidechain, tile_r=128))
    out = fwd(rep0, rep1, packed)
    jax.block_until_ready(out)

    ua_ref, ang_ref, denom_ref = ref_forward(rep0, rep1, params)
    ua = out["unnormalized_angles_sin_cos"]
    ang = out["angles_sin_cos"]

    assert ua.shape == (N_RES, N_TORSIONS, 2)
    assert ang.shape == (N_RES, N_TORSIONS, 2)
    assert jnp.allclose(ua, ua_ref, atol=3e-3, rtol=3e-3), \
        float(jnp.max(jnp.abs(ua - ua_ref)))
    # Norm-weighted check for the normalized angles: pairs with tiny (sin, cos)
    # magnitude legitimately amplify matmul rounding after l2-normalization.
    assert jnp.allclose(ang * denom_ref, ua_ref, atol=3e-3, rtol=3e-3), \
        float(jnp.max(jnp.abs(ang * denom_ref - ua_ref)))
    # Normalized pairs should be (near) unit norm where the raw pair isn't tiny.
    norms = jnp.sum(ang * ang, axis=-1)
    assert bool(jnp.all(jnp.where(denom_ref[..., 0] > 1e-2,
                                  jnp.abs(norms - 1.0) < 1e-2, True)))

    print("KERNEL_OK")
</pallas_src>

<mosaic_0001>
module attributes {stable_mosaic.version = 11 : i64} {
  func.func @sidechain_kernel(%arg0: i32, %arg1: memref<128x128xbf16, #tpu.memory_space<vmem>>, %arg2: memref<320x32xbf16, #tpu.memory_space<vmem>>, %arg3: memref<7x1x32xf32, #tpu.memory_space<vmem>>, %arg4: memref<128x32xf32, #tpu.memory_space<vmem>>, %arg5: memref<128x32xf32, #tpu.memory_space<vmem>>, %arg6: memref<128x32xf32, #tpu.memory_space<vmem>>, %arg7: memref<128x32xf32, #tpu.memory_space<vmem>>) attributes {dimension_semantics = [#tpu.dimension_semantics<parallel>], iteration_bounds = array<i64: 2>, scalar_prefetch = 0 : i64, scratch_operands = 0 : i64, tpu.core_type = #tpu.core_type<tc>, window_params = [{transform_indices = @transform_0, window_bounds = array<i64: 128, 128>}, {pipeline_mode = #tpu.pipeline_mode<synchronous>, transform_indices = @transform_1, window_bounds = array<i64: 320, 32>}, {pipeline_mode = #tpu.pipeline_mode<synchronous>, transform_indices = @transform_2, window_bounds = array<i64: 7, 1, 32>}, {transform_indices = @transform_3, window_bounds = array<i64: 128, 32>}, {transform_indices = @transform_4, window_bounds = array<i64: 128, 32>}, {transform_indices = @transform_5, window_bounds = array<i64: 128, 32>}, {transform_indices = @transform_6, window_bounds = array<i64: 128, 32>}]} {
    %c0 = arith.constant 0 : index
    %c0_0 = arith.constant 0 : index
    %0 = vector.load %arg1[%c0, %c0_0] : memref<128x128xbf16, #tpu.memory_space<vmem>>, vector<128x128xbf16>
    %cst = arith.constant 0.000000e+00 : bf16
    %1 = vector.broadcast %cst : bf16 to vector<128x128xbf16>
    %2 = arith.maximumf %0, %1 : vector<128x128xbf16>
    %c0_1 = arith.constant 0 : index
    %c0_2 = arith.constant 0 : index
    %3 = vector.load %arg2[%c0_1, %c0_2] : memref<320x32xbf16, #tpu.memory_space<vmem>>, vector<128x32xbf16>
    %cst_3 = arith.constant dense<0.000000e+00> : vector<128x32xf32>
    %4 = tpu.matmul %2, %3, %cst_3 {dimension_numbers = #tpu.dot_dimension_numbers<[1], [0], [0], [1], [0, 0, 1, 1], [], []>} : vector<128x128xbf16>, vector<128x32xbf16>, vector<128x32xf32> -> vector<128x32xf32>
    %c0_4 = arith.constant 0 : index
    %c0_5 = arith.constant 0 : index
    %c0_6 = arith.constant 0 : index
    %5 = vector.load %arg3[%c0_4, %c0_5, %c0_6] : memref<7x1x32xf32, #tpu.memory_space<vmem>>, vector<1x1x32xf32>
    %6 = vector.shape_cast %5 : vector<1x1x32xf32> to vector<1x32xf32>
    %7 = vector.broadcast %6 : vector<1x32xf32> to vector<128x32xf32>
    %8 = arith.addf %4, %7 : vector<128x32xf32>
    %cst_7 = arith.constant 0.000000e+00 : f32
    %9 = vector.broadcast %cst_7 : f32 to vector<128x32xf32>
    %10 = arith.maximumf %8, %9 : vector<128x32xf32>
    %11 = arith.truncf %10 : vector<128x32xf32> to vector<128x32xbf16>
    %c128 = arith.constant 128 : index
    %c0_8 = arith.constant 0 : index
    %12 = vector.load %arg2[%c128, %c0_8] : memref<320x32xbf16, #tpu.memory_space<vmem>>, vector<32x32xbf16>
    %cst_9 = arith.constant dense<0.000000e+00> : vector<128x32xf32>
    %13 = tpu.matmul %11, %12, %cst_9 {dimension_numbers = #tpu.dot_dimension_numbers<[1], [0], [0], [1], [0, 0, 1, 1], [], []>} : vector<128x32xbf16>, vector<32x32xbf16>, vector<128x32xf32> -> vector<128x32xf32>
    %c1 = arith.constant 1 : index
    %c0_10 = arith.constant 0 : index
    %c0_11 = arith.constant 0 : index
    %14 = vector.load %arg3[%c1, %c0_10, %c0_11] : memref<7x1x32xf32, #tpu.memory_space<vmem>>, vector<1x1x32xf32>
    %15 = vector.shape_cast %14 : vector<1x1x32xf32> to vector<1x32xf32>
    %16 = vector.broadcast %15 : vector<1x32xf32> to vector<128x32xf32>
    %17 = arith.addf %13, %16 : vector<128x32xf32>
    %cst_12 = arith.constant 0.000000e+00 : f32
    %18 = vector.broadcast %cst_12 : f32 to vector<128x32xf32>
    %19 = arith.maximumf %17, %18 : vector<128x32xf32>
    %20 = arith.truncf %19 : vector<128x32xf32> to vector<128x32xbf16>
    %c160 = arith.constant 160 : index
    %c0_13 = arith.constant 0 : index
    %21 = vector.load %arg2[%c160, %c0_13] : memref<320x32xbf16, #tpu.memory_space<vmem>>, vector<32x32xbf16>
    %cst_14 = arith.constant dense<0.000000e+00> : vector<128x32xf32>
    %22 = tpu.matmul %20, %21, %cst_14 {dimension_numbers = #tpu.dot_dimension_numbers<[1], [0], [0], [1], [0, 0, 1, 1], [], []>} : vector<128x32xbf16>, vector<32x32xbf16>, vector<128x32xf32> -> vector<128x32xf32>
    %c2 = arith.constant 2 : index
    %c0_15 = arith.constant 0 : index
    %c0_16 = arith.constant 0 : index
    %23 = vector.load %arg3[%c2, %c0_15, %c0_16] : memref<7x1x32xf32, #tpu.memory_space<vmem>>, vector<1x1x32xf32>
    %24 = vector.shape_cast %23 : vector<1x1x32xf32> to vector<1x32xf32>
    %25 = vector.broadcast %24 : vector<1x32xf32> to vector<128x32xf32>
    %26 = arith.addf %22, %25 : vector<128x32xf32>
    %27 = arith.addf %8, %26 : vector<128x32xf32>
    %cst_17 = arith.constant 0.000000e+00 : f32
    %28 = vector.broadcast %cst_17 : f32 to vector<128x32xf32>
    %29 = arith.maximumf %27, %28 : vector<128x32xf32>
    %30 = arith.truncf %29 : vector<128x32xf32> to vector<128x32xbf16>
    %c192 = arith.constant 192 : index
    %c0_18 = arith.constant 0 : index
    %31 = vector.load %arg2[%c192, %c0_18] : memref<320x32xbf16, #tpu.memory_space<vmem>>, vector<32x32xbf16>
    %cst_19 = arith.constant dense<0.000000e+00> : vector<128x32xf32>
    %32 = tpu.matmul %30, %31, %cst_19 {dimension_numbers = #tpu.dot_dimension_numbers<[1], [0], [0], [1], [0, 0, 1, 1], [], []>} : vector<128x32xbf16>, vector<32x32xbf16>, vector<128x32xf32> -> vector<128x32xf32>
    %c3 = arith.constant 3 : index
    %c0_20 = arith.constant 0 : index
    %c0_21 = arith.constant 0 : index
    %33 = vector.load %arg3[%c3, %c0_20, %c0_21] : memref<7x1x32xf32, #tpu.memory_space<vmem>>, vector<1x1x32xf32>
    %34 = vector.shape_cast %33 : vector<1x1x32xf32> to vector<1x32xf32>
    %35 = vector.broadcast %34 : vector<1x32xf32> to vector<128x32xf32>
    %36 = arith.addf %32, %35 : vector<128x32xf32>
    %cst_22 = arith.constant 0.000000e+00 : f32
    %37 = vector.broadcast %cst_22 : f32 to vector<128x32xf32>
    %38 = arith.maximumf %36, %37 : vector<128x32xf32>
    %39 = arith.truncf %38 : vector<128x32xf32> to vector<128x32xbf16>
    %c224 = arith.constant 224 : index
    %c0_23 = arith.constant 0 : index
    %40 = vector.load %arg2[%c224, %c0_23] : memref<320x32xbf16, #tpu.memory_space<vmem>>, vector<32x32xbf16>
    %cst_24 = arith.constant dense<0.000000e+00> : vector<128x32xf32>
    %41 = tpu.matmul %39, %40, %cst_24 {dimension_numbers = #tpu.dot_dimension_numbers<[1], [0], [0], [1], [0, 0, 1, 1], [], []>} : vector<128x32xbf16>, vector<32x32xbf16>, vector<128x32xf32> -> vector<128x32xf32>
    %c4 = arith.constant 4 : index
    %c0_25 = arith.constant 0 : index
    %c0_26 = arith.constant 0 : index
    %42 = vector.load %arg3[%c4, %c0_25, %c0_26] : memref<7x1x32xf32, #tpu.memory_space<vmem>>, vector<1x1x32xf32>
    %43 = vector.shape_cast %42 : vector<1x1x32xf32> to vector<1x32xf32>
    %44 = vector.broadcast %43 : vector<1x32xf32> to vector<128x32xf32>
    %45 = arith.addf %41, %44 : vector<128x32xf32>
    %46 = arith.addf %27, %45 : vector<128x32xf32>
    %cst_27 = arith.constant 0.000000e+00 : f32
    %47 = vector.broadcast %cst_27 : f32 to vector<128x32xf32>
    %48 = arith.maximumf %46, %47 : vector<128x32xf32>
    %49 = arith.truncf %48 : vector<128x32xf32> to vector<128x32xbf16>
    %c256 = arith.constant 256 : index
    %c0_28 = arith.constant 0 : index
    %50 = vector.load %arg2[%c256, %c0_28] : memref<320x32xbf16, #tpu.memory_space<vmem>>, vector<32x32xbf16>
    %cst_29 = arith.constant dense<0.000000e+00> : vector<128x32xf32>
    %51 = tpu.matmul %49, %50, %cst_29 {dimension_numbers = #tpu.dot_dimension_numbers<[1], [0], [0], [1], [0, 0, 1, 1], [], []>} : vector<128x32xbf16>, vector<32x32xbf16>, vector<128x32xf32> -> vector<128x32xf32>
    %c5 = arith.constant 5 : index
    %c0_30 = arith.constant 0 : index
    %c0_31 = arith.constant 0 : index
    %52 = vector.load %arg3[%c5, %c0_30, %c0_31] : memref<7x1x32xf32, #tpu.memory_space<vmem>>, vector<1x1x32xf32>
    %53 = vector.shape_cast %52 : vector<1x1x32xf32> to vector<1x32xf32>
    %54 = vector.broadcast %53 : vector<1x32xf32> to vector<128x32xf32>
    %55 = arith.addf %51, %54 : vector<128x32xf32>
    %c288 = arith.constant 288 : index
    %c0_32 = arith.constant 0 : index
    %56 = vector.load %arg2[%c288, %c0_32] : memref<320x32xbf16, #tpu.memory_space<vmem>>, vector<32x32xbf16>
    %cst_33 = arith.constant dense<0.000000e+00> : vector<128x32xf32>
    %57 = tpu.matmul %49, %56, %cst_33 {dimension_numbers = #tpu.dot_dimension_numbers<[1], [0], [0], [1], [0, 0, 1, 1], [], []>} : vector<128x32xbf16>, vector<32x32xbf16>, vector<128x32xf32> -> vector<128x32xf32>
    %c6 = arith.constant 6 : index
    %c0_34 = arith.constant 0 : index
    %c0_35 = arith.constant 0 : index
    %58 = vector.load %arg3[%c6, %c0_34, %c0_35] : memref<7x1x32xf32, #tpu.memory_space<vmem>>, vector<1x1x32xf32>
    %59 = vector.shape_cast %58 : vector<1x1x32xf32> to vector<1x32xf32>
    %60 = vector.broadcast %59 : vector<1x32xf32> to vector<128x32xf32>
    %61 = arith.addf %57, %60 : vector<128x32xf32>
    %c0_36 = arith.constant 0 : index
    %c0_37 = arith.constant 0 : index
    %62 = vector.load %arg4[%c0_36, %c0_37] : memref<128x32xf32, #tpu.memory_space<vmem>>, vector<128x32xf32>
    tpu.vector_store %arg4[%c0_36, %c0_37], %55 {strides = array<i32>} : memref<128x32xf32, #tpu.memory_space<vmem>>, vector<128x32xf32>,
    %c0_38 = arith.constant 0 : index
    %c0_39 = arith.constant 0 : index
    %63 = vector.load %arg5[%c0_38, %c0_39] : memref<128x32xf32, #tpu.memory_space<vmem>>, vector<128x32xf32>
    tpu.vector_store %arg5[%c0_38, %c0_39], %61 {strides = array<i32>} : memref<128x32xf32, #tpu.memory_space<vmem>>, vector<128x32xf32>,
    %64 = arith.mulf %55, %55 : vector<128x32xf32>
    %65 = arith.mulf %61, %61 : vector<128x32xf32>
    %66 = arith.addf %64, %65 : vector<128x32xf32>
    %cst_40 = arith.constant 9.99999996E-13 : f32
    %67 = vector.broadcast %cst_40 : f32 to vector<128x32xf32>
    %68 = arith.maximumf %66, %67 : vector<128x32xf32>
    %69 = math.rsqrt %68 : vector<128x32xf32>
    %70 = arith.mulf %55, %69 : vector<128x32xf32>
    %c0_41 = arith.constant 0 : index
    %c0_42 = arith.constant 0 : index
    %71 = vector.load %arg6[%c0_41, %c0_42] : memref<128x32xf32, #tpu.memory_space<vmem>>, vector<128x32xf32>
    tpu.vector_store %arg6[%c0_41, %c0_42], %70 {strides = array<i32>} : memref<128x32xf32, #tpu.memory_space<vmem>>, vector<128x32xf32>,
    %72 = arith.mulf %61, %69 : vector<128x32xf32>
    %c0_43 = arith.constant 0 : index
    %c0_44 = arith.constant 0 : index
    %73 = vector.load %arg7[%c0_43, %c0_44] : memref<128x32xf32, #tpu.memory_space<vmem>>, vector<128x32xf32>
    tpu.vector_store %arg7[%c0_43, %c0_44], %72 {strides = array<i32>} : memref<128x32xf32, #tpu.memory_space<vmem>>, vector<128x32xf32>,
    return
  }
  func.func @transform_0(%arg0: i32) -> (i32, i32) {
    %c0_i32 = arith.constant 0 : i32
    %c0_i32_0 = arith.constant 0 : i32
    return %arg0, %c0_i32 : i32, i32
  }
  func.func @transform_1(%arg0: i32) -> (i32, i32) {
    %c0_i32 = arith.constant 0 : i32
    %c0_i32_0 = arith.constant 0 : i32
    %c0_i32_1 = arith.constant 0 : i32
    return %c0_i32, %c0_i32_0 : i32, i32
  }
  func.func @transform_2(%arg0: i32) -> (i32, i32, i32) {
    %c0_i32 = arith.constant 0 : i32
    %c0_i32_0 = arith.constant 0 : i32
    %c0_i32_1 = arith.constant 0 : i32
    %c0_i32_2 = arith.constant 0 : i32
    return %c0_i32, %c0_i32_0, %c0_i32_1 : i32, i32, i32
  }
  func.func @transform_3(%arg0: i32) -> (i32, i32) {
    %c0_i32 = arith.constant 0 : i32
    %c0_i32_0 = arith.constant 0 : i32
    return %arg0, %c0_i32 : i32, i32
  }
  func.func @transform_4(%arg0: i32) -> (i32, i32) {
    %c0_i32 = arith.constant 0 : i32
    %c0_i32_0 = arith.constant 0 : i32
    return %arg0, %c0_i32 : i32, i32
  }
  func.func @transform_5(%arg0: i32) -> (i32, i32) {
    %c0_i32 = arith.constant 0 : i32
    %c0_i32_0 = arith.constant 0 : i32
    return %arg0, %c0_i32 : i32, i32
  }
  func.func @transform_6(%arg0: i32) -> (i32, i32) {
    %c0_i32 = arith.constant 0 : i32
    %c0_i32_0 = arith.constant 0 : i32
    return %arg0, %c0_i32 : i32, i32
  }
}

</mosaic_0001>

<bundles_post_ra>
// kernel: multi_rigid_sidechain.1
= control target key start
LH: loop header
LB: loop body
LE: loop exit
PB: predicated region body
PF: predicated region fallthrough
CT: control target
= control target key end

     0   :  { %s1946_s21 = smov 0   ;;  %s2655_s0 = inlined_call_operand.vmem [shape: bf16[256,128], index: 0, kind: input, shape index: {}]   ;;  %s2656_s1 = inlined_call_operand.vmem [shape: bf16[320,32], index: 1, kind: input, shape index: {}]   ;;  %s2657_s2 = inlined_call_operand.vmem [shape: f32[7,1,32], index: 2, kind: input, shape index: {}]   ;;  %s2658_s3 = inlined_call_operand.vmem [shape: f32[256,32], index: 3, kind: output, shape index: {0}]   ;;  %s2659_s4 = inlined_call_operand.vmem [shape: f32[256,32], index: 4, kind: output, shape index: {1}]   ;;  %s2660_s5 = inlined_call_operand.vmem [shape: f32[256,32], index: 5, kind: output, shape index: {2}]   ;;  %s2661_s6 = inlined_call_operand.vmem [shape: f32[256,32], index: 6, kind: output, shape index: {3}]  }
   0x1 LB: > { %s1640_s22 = sadd.s32 4294967295, %s1909_s21   ;;  %p1644_p0 = scmp.ge.s32.totalorder %s1909_s21, 1  ;;  %s1909_s21 = sphi %s1946_s21, %s17_s21  }
   0x2   : > { %p220_p1 = scmp.lt.s32.totalorder %s1909_s21, 3 }
   0x4   : > { %p221_p2 = pnand %p1644_p0, %p220_p1 }
   0x5   : > { %s1645_s25 = sshll.u32 (!%p221_p2), %s1640_s22, 4 }
   0x6   : > { %224 = sbr.rel (%p221_p2) target bundleno = 1041 (0x411), region = 32  ;;  %p266_p3 = scmp.lt.s32.totalorder (!%p221_p2), %s1645_s25, 31 }
   0xb   : > { %v1798_v0 = vld [vmem:[%s2656_s1 + $0x38] sm:$0xff]  ;;  %v1797_v1 = vld [vmem:[%s2656_s1 + $0x30] sm:$0xff]  ;;  %v1796_v2 = vld [vmem:[%s2656_s1 + $0x28] sm:$0xff]  ;;  %s2663_s25 = smov (!%p266_p3, %s1645_s25), 31  ;;  %vm514_vm0 = vcmask 261120  }
   0xc   : > { %420 = vmatpush.bf16.msra.mxu0 %v1798_v0  ;;  %v1795_v3 = vld [vmem:[%s2656_s1 + $0x20] sm:$0xff]  ;;  %s1646_s8 = sshll.u32 %s2663_s25, 2  ;;  %v1794_v4 = vld [vmem:[%s2656_s1 + $0x18] sm:$0xff]  ;;  %v1800_v5 = vld [vmem:[%s2656_s1 + $0x48] sm:$0xff]  ;;  %s2312_s10 = sshll.u32 %s2663_s25, 3 }
   0xd   : > { %s1975_s13 = scalar_lea.vmem %s2655_s0, %s1646_s8  ;;  %v1793_v6 = vld [vmem:[%s2656_s1 + $0x10] sm:$0xff]  ;;  %1850 = vmatpush.bf16.msra.mxu1 %v1800_v5  ;;  %v1792_v10 = vld [vmem:[%s2656_s1 + $0x8] sm:$0xff]  ;;  %v1791_v13 = vld [vmem:[%s2656_s1] sm:$0xff]  ;;  %s2328_s17 = scalar_lea.vmem %s2658_s3, %s2312_s10 }
   0xe   : > { %v1812_v7 = vld [vmem:[%s1975_s13] sm:$0xff]   ;;  %v1843_v15 = vld [vmem:[%s1975_s13 + $0x8] sm:$0xff]   ;;  %v1844_v21 = vld [vmem:[%s1975_s13 + $0x10] sm:$0xff]   ;;  %s2335_s19 = scalar_lea.vmem %s2659_s4, %s2312_s10  ;;  %s2352_s23 = scalar_lea.vmem %s2660_s5, %s2312_s10 }
   0xf   : > { %v1813_v8 = vunpack.c.l.bf16 %v1812_v7  ;;  %v1814_v9 = vunpack.c.h.bf16 %v1812_v7  ;;  %v1817_v16 = vunpack.c.l.bf16 %v1843_v15  ;;  %v1818_v17 = vunpack.c.h.bf16 %v1843_v15  ;;  %v1845_v27 = vld [vmem:[%s1975_s13 + $0x18] sm:$0xff]   ;;  %v1799_v33 = vld [vmem:[%s2656_s1 + $0x40] sm:$0xff]  ;;  %v1847_v40 = vld [vmem:[%s1975_s13 + $0x28] sm:$0xff]   ;;  %s2358_s27 = scalar_lea.vmem %s2661_s6, %s2312_s10 }
  0x10   : > { %421 = vmatpush.bf16.msra.mxu0 %v1797_v1  ;;  %v1821_v22 = vunpack.c.l.bf16 %v1844_v21  ;;  %v1822_v23 = vunpack.c.h.bf16 %v1844_v21  ;;  %v1825_v28 = vunpack.c.l.bf16 %v1845_v27  ;;  %v1826_v29 = vunpack.c.h.bf16 %v1845_v27  ;;  %v1846_v34 = vld [vmem:[%s1975_s13 + $0x20] sm:$0xff]   ;;  %v1848_v46 = vld [vmem:[%s1975_s13 + $0x30] sm:$0xff]   ;;  %v1849_v52 = vld [vmem:[%s1975_s13 + $0x38] sm:$0xff]  }
  0x11   : > { %v328_v11 = vmax.f32 %v1813_v8, 0.0  ;;  %v329_v12 = vmax.f32 %v1814_v9, 0.0  ;;  %v330_v18 = vmax.f32 %v1817_v16, 0.0  ;;  %v331_v19 = vmax.f32 %v1818_v17, 0.0  ;;  %1851 = vmatpush.bf16.msra.mxu1 %v1799_v33  ;;  %v2003_v59 = vld [vmem:[%s2657_s2] ss:$0 sm:$0xff] }
  0x12   : > { %v332_v24 = vmax.f32 %v1821_v22, 0.0  ;;  %v333_v25 = vmax.f32 %v1822_v23, 0.0  ;;  %v334_v30 = vmax.f32 %v1825_v28, 0.0  ;;  %v335_v31 = vmax.f32 %v1826_v29, 0.0 }
  0x13   : > { %v344_v14 = vpack.c.bf16 %v329_v12, %v328_v11  ;;  %v345_v20 = vpack.c.bf16 %v331_v19, %v330_v18  ;;  %v1829_v35 = vunpack.c.l.bf16 %v1846_v34  ;;  %v1830_v36 = vunpack.c.h.bf16 %v1846_v34 }
  0x14   : > { %422 = vmatpush.bf16.msra.mxu0 %v1796_v2  ;;  %v346_v26 = vpack.c.bf16 %v333_v25, %v332_v24  ;;  %v347_v32 = vpack.c.bf16 %v335_v31, %v334_v30  ;;  %v1833_v41 = vunpack.c.l.bf16 %v1847_v40  ;;  %v1834_v42 = vunpack.c.h.bf16 %v1847_v40 }
  0x15   : > { %v336_v37 = vmax.f32 %v1829_v35, 0.0  ;;  %v337_v38 = vmax.f32 %v1830_v36, 0.0  ;;  %v1837_v47 = vunpack.c.l.bf16 %v1848_v46  ;;  %v1838_v48 = vunpack.c.h.bf16 %v1848_v46  ;;  %v1801_v46 = vld [vmem:[%s2656_s1 + $0x50] sm:$0xff] }
  0x16   : > { %v338_v43 = vmax.f32 %v1833_v41, 0.0  ;;  %v339_v44 = vmax.f32 %v1834_v42, 0.0  ;;  %v1841_v53 = vunpack.c.l.bf16 %v1849_v52  ;;  %v1842_v54 = vunpack.c.h.bf16 %v1849_v52 }
  0x17   : > { %v348_v39 = vpack.c.bf16 %v337_v38, %v336_v37  ;;  %v340_v49 = vmax.f32 %v1837_v47, 0.0  ;;  %v341_v50 = vmax.f32 %v1838_v48, 0.0 }
  0x18   : > { %423 = vmatpush.bf16.msra.mxu0 %v1795_v3  ;;  %v349_v45 = vpack.c.bf16 %v339_v44, %v338_v43  ;;  %v342_v55 = vmax.f32 %v1841_v53, 0.0  ;;  %v343_v56 = vmax.f32 %v1842_v54, 0.0  ;;  %v2086_v54 = vld [vmem:[%s2657_s2 + $0x1] ss:$0 sm:$0xff] }
  0x19   : > { %v350_v51 = vpack.c.bf16 %v341_v50, %v340_v49 }
  0x1a   : > { %v351_v57 = vpack.c.bf16 %v343_v56, %v342_v55 }
  0x1c   : > { %424 = vmatpush.bf16.msra.mxu0 %v1794_v4 }
  0x20   : > { %425 = vmatpush.bf16.msra.mxu0 %v1793_v6 }
  0x24   : > { %426 = vmatpush.bf16.msra.mxu0 %v1792_v10 }
  0x28   : > { %427 = vmatpush.bf16.msra.mxu0 %v1791_v13 }
  0x2b   : > { %428 = vmatmul.bf16.vlgmr.msra.gmra.mxu0 %v344_v14 }
  0x2c   : > { %545 = vmatpush.bf16.msrb.mxu0 %v1800_v5 }
  0x30   : > { %546 = vmatpush.bf16.msrb.mxu0 %v1799_v33 }
  0x3b   : > { %433 = vmatmul.bf16.gmra.mxu0 %v345_v20 }
  0x4b   : > { %438 = vmatmul.bf16.gmra.mxu0 %v346_v26 }
  0x5b   : > { %443 = vmatmul.bf16.gmra.mxu0 %v347_v32 }
  0x6b   : > { %448 = vmatmul.bf16.gmra.mxu0 %v348_v39 }
  0x7b   : > { %453 = vmatmul.bf16.gmra.mxu0 %v349_v45  ;;  %v1802_v45 = vld [vmem:[%s2656_s1 + $0x58] sm:$0xff] }
  0x7c   : > { %663 = vmatpush.bf16.msra.mxu0 %v1802_v45  ;;  %1852 = vmatpush.bf16.msra.mxu2 %v1802_v45 }
  0x80   : > { %664 = vmatpush.bf16.msra.mxu0 %v1801_v46  ;;  %1853 = vmatpush.bf16.msra.mxu2 %v1801_v46 }
  0x8b   : > { %458 = vmatmul.bf16.gmra.mxu0 %v350_v51 }
  0x9b   : > { %463 = vmatmul.bf16.gmra.mxu0 %v351_v57 }
  0xa8   : > { %v429_v58 = vpop.f32.mrf.mxu0 }
  0xa9   : > { %v2006_v60 = vadd.f32 %v2003_v59, %v429_v58 }
  0xab   : > { %v469_v63 = vmax.f32 %v2006_v60, 0.0 }
  0xb0   : > { %v431_v61 = vpop.f32.mrf.mxu0 }
  0xb1   : > { %v2009_v62 = vadd.f32 %v2003_v59, %v431_v61 }
  0xb3   : > { %v470_v0 = vmax.f32 %v2009_v62, 0.0 }
  0xb5   : > { %v485_v1 = vpack.c.bf16 %v470_v0, %v469_v63 }
  0xb7   : > { %1696 = vmatmul.msk.bf16.vlgmr.msrb.gmra.mxu0 %vm514_vm0, %v485_v1 }
  0xb8   : > { %v434_v2 = vpop.f32.mrf.mxu0 }
  0xb9   : > { %v2015_v3 = vadd.f32 %v2003_v59, %v434_v2 }
  0xbb   : > { %v471_v6 = vmax.f32 %v2015_v3, 0.0 }
  0xc0   : > { %v436_v4 = vpop.f32.mrf.mxu0 }
  0xc1   : > { %v2018_v5 = vadd.f32 %v2003_v59, %v436_v4 }
  0xc3   : > { %v472_v7 = vmax.f32 %v2018_v5, 0.0 }
  0xc5   : > { %v486_v8 = vpack.c.bf16 %v472_v7, %v471_v6 }
  0xc7   : > { %1697 = vmatmul.msk.bf16.vlgmr.msra.gmra.mxu1 %vm514_vm0, %v486_v8 }
  0xc8   : > { %v439_v9 = vpop.f32.mrf.mxu0 }
  0xc9   : > { %v2024_v10 = vadd.f32 %v2003_v59, %v439_v9 }
  0xcb   : > { %v473_v13 = vmax.f32 %v2024_v10, 0.0 }
  0xd0   : > { %v441_v11 = vpop.f32.mrf.mxu0 }
  0xd1   : > { %v2027_v12 = vadd.f32 %v2003_v59, %v441_v11 }
  0xd3   : > { %v474_v14 = vmax.f32 %v2027_v12, 0.0 }
  0xd5   : > { %v487_v15 = vpack.c.bf16 %v474_v14, %v473_v13 }
  0xd7   : > { %1698 = vmatmul.msk.bf16.gmra.mxu1 %vm514_vm0, %v487_v15 }
  0xd8   : > { %v444_v16 = vpop.f32.mrf.mxu0 }
  0xd9   : > { %v2033_v17 = vadd.f32 %v2003_v59, %v444_v16 }
  0xdb   : > { %v475_v20 = vmax.f32 %v2033_v17, 0.0 }
  0xe0   : > { %v446_v18 = vpop.f32.mrf.mxu0 }
  0xe1   : > { %v2036_v19 = vadd.f32 %v2003_v59, %v446_v18 }
  0xe3   : > { %v476_v21 = vmax.f32 %v2036_v19, 0.0 }
  0xe5   : > { %v488_v22 = vpack.c.bf16 %v476_v21, %v475_v20 }
  0xe7   : > { %1699 = vmatmul.msk.bf16.gmra.mxu1 %vm514_vm0, %v488_v22 }
  0xe8   : > { %v449_v23 = vpop.f32.mrf.mxu0 }
  0xe9   : > { %v2042_v24 = vadd.f32 %v2003_v59, %v449_v23 }
  0xeb   : > { %v477_v27 = vmax.f32 %v2042_v24, 0.0 }
  0xf0   : > { %v451_v25 = vpop.f32.mrf.mxu0 }
  0xf1   : > { %v2045_v26 = vadd.f32 %v2003_v59, %v451_v25 }
  0xf3   : > { %v478_v28 = vmax.f32 %v2045_v26, 0.0 }
  0xf5   : > { %v489_v29 = vpack.c.bf16 %v478_v28, %v477_v27 }
  0xf7   : > { %1700 = vmatmul.msk.bf16.gmra.mxu1 %vm514_vm0, %v489_v29 }
  0xf8   : > { %v454_v30 = vpop.f32.mrf.mxu0 }
  0xf9   : > { %v2051_v31 = vadd.f32 %v2003_v59, %v454_v30 }
  0xfb   : > { %v479_v34 = vmax.f32 %v2051_v31, 0.0 }
 0x100   : > { %v456_v32 = vpop.f32.mrf.mxu0 }
 0x101   : > { %v2054_v33 = vadd.f32 %v2003_v59, %v456_v32 }
 0x103   : > { %v480_v35 = vmax.f32 %v2054_v33, 0.0 }
 0x105   : > { %v490_v36 = vpack.c.bf16 %v480_v35, %v479_v34 }
 0x107   : > { %1701 = vmatmul.msk.bf16.gmra.mxu1 %vm514_vm0, %v490_v36 }
 0x108   : > { %v459_v37 = vpop.f32.mrf.mxu0 }
 0x109   : > { %v2060_v38 = vadd.f32 %v2003_v59, %v459_v37 }
 0x10b   : > { %v481_v41 = vmax.f32 %v2060_v38, 0.0 }
 0x110   : > { %v461_v39 = vpop.f32.mrf.mxu0 }
 0x111   : > { %v2063_v40 = vadd.f32 %v2003_v59, %v461_v39 }
 0x113   : > { %v482_v42 = vmax.f32 %v2063_v40, 0.0 }
 0x115   : > { %v491_v43 = vpack.c.bf16 %v482_v42, %v481_v41 }
 0x117   : > { %1702 = vmatmul.msk.bf16.gmra.mxu1 %vm514_vm0, %v491_v43 }
 0x118   : > { %v464_v44 = vpop.f32.mrf.mxu0 }
 0x119   : > { %v2075_v47 = vadd.f32 %v2003_v59, %v464_v44 }
 0x11b   : > { %v483_v50 = vmax.f32 %v2075_v47, 0.0 }
 0x120   : > { %v466_v48 = vpop.f32.mrf.mxu0 }
 0x121   : > { %v2078_v49 = vadd.f32 %v2003_v59, %v466_v48 }
 0x123   : > { %v484_v51 = vmax.f32 %v2078_v49, 0.0 }
 0x125   : > { %v492_v52 = vpack.c.bf16 %v484_v51, %v483_v50 }
 0x127   : > { %1703 = vmatmul.msk.bf16.gmra.mxu1 %vm514_vm0, %v492_v52 }
 0x134   : > { %v548_v53 = vpop.f32.mrf.mxu0 }
 0x135   : > { %v549_v55 = vadd.f32 %v2086_v54, %v548_v53 }
 0x137   : > { %v588_v58 = vmax.f32 %v549_v55, 0.0 }
 0x13c   : > { %v550_v56 = vpop.f32.mrf.mxu0 }
 0x13d   : > { %v551_v57 = vadd.f32 %v2086_v54, %v550_v56 }
 0x13f   : > { %v589_v59 = vmax.f32 %v551_v57, 0.0  ;;  %v1804_v57 = vld [vmem:[%s2656_s1 + $0x68] sm:$0xff] }
 0x140   : > { %797 = vmatpush.bf16.msrb.mxu0 %v1804_v57  ;;  %1854 = vmatpush.bf16.msra.mxu3 %v1804_v57 }
 0x141   : > { %v604_v61 = vpack.c.bf16 %v589_v59, %v588_v58 }
 0x143   : > { %1713 = vmatmul.msk.bf16.vlgmr.msra.gmra.mxu0 %vm514_vm0, %v604_v61  ;;  %v1803_v61 = vld [vmem:[%s2656_s1 + $0x60] sm:$0xff] }
 0x144   : > { %v553_v63 = vpop.f32.mrf.mxu1  ;;  %798 = vmatpush.bf16.msrb.mxu0 %v1803_v61  ;;  %1855 = vmatpush.bf16.msra.mxu3 %v1803_v61 }
 0x145   : > { %v554_v0 = vadd.f32 %v2086_v54, %v553_v63 }
 0x147   : > { %v590_v4 = vmax.f32 %v554_v0, 0.0 }
 0x14c   : > { %v555_v1 = vpop.f32.mrf.mxu1 }
 0x14d   : > { %v556_v2 = vadd.f32 %v2086_v54, %v555_v1 }
 0x14f   : > { %v591_v6 = vmax.f32 %v556_v2, 0.0 }
 0x151   : > { %v605_v7 = vpack.c.bf16 %v591_v6, %v590_v4  ;;  %v2121_v6 = vld [vmem:[%s2657_s2 + $0x2] ss:$0 sm:$0xff] }
 0x153   : > { %1714 = vmatmul.msk.bf16.vlgmr.msra.gmra.mxu2 %vm514_vm0, %v605_v7 }
 0x154   : > { %v558_v8 = vpop.f32.mrf.mxu1 }
 0x155   : > { %v559_v9 = vadd.f32 %v2086_v54, %v558_v8 }
 0x157   : > { %v592_v14 = vmax.f32 %v559_v9, 0.0 }
 0x15c   : > { %v560_v11 = vpop.f32.mrf.mxu1 }
 0x15d   : > { %v561_v13 = vadd.f32 %v2086_v54, %v560_v11 }
 0x15f   : > { %v593_v15 = vmax.f32 %v561_v13, 0.0 }
 0x161   : > { %v606_v16 = vpack.c.bf16 %v593_v15, %v592_v14 }
 0x163   : > { %1715 = vmatmul.msk.bf16.gmra.mxu2 %vm514_vm0, %v606_v16 }
 0x164   : > { %v563_v18 = vpop.f32.mrf.mxu1 }
 0x165   : > { %v564_v20 = vadd.f32 %v2086_v54, %v563_v18 }
 0x167   : > { %v594_v23 = vmax.f32 %v564_v20, 0.0 }
 0x16c   : > { %v565_v21 = vpop.f32.mrf.mxu1 }
 0x16d   : > { %v566_v22 = vadd.f32 %v2086_v54, %v565_v21 }
 0x16f   : > { %v595_v25 = vmax.f32 %v566_v22, 0.0 }
 0x171   : > { %v607_v27 = vpack.c.bf16 %v595_v25, %v594_v23 }
 0x173   : > { %1716 = vmatmul.msk.bf16.gmra.mxu2 %vm514_vm0, %v607_v27 }
 0x174   : > { %v568_v28 = vpop.f32.mrf.mxu1 }
 0x175   : > { %v569_v29 = vadd.f32 %v2086_v54, %v568_v28 }
 0x177   : > { %v596_v34 = vmax.f32 %v569_v29, 0.0 }
 0x17c   : > { %v570_v30 = vpop.f32.mrf.mxu1 }
 0x17d   : > { %v571_v32 = vadd.f32 %v2086_v54, %v570_v30 }
 0x17f   : > { %v597_v35 = vmax.f32 %v571_v32, 0.0 }
 0x181   : > { %v608_v36 = vpack.c.bf16 %v597_v35, %v596_v34 }
 0x183   : > { %1717 = vmatmul.msk.bf16.gmra.mxu2 %vm514_vm0, %v608_v36 }
 0x184   : > { %v573_v37 = vpop.f32.mrf.mxu1 }
 0x185   : > { %v574_v39 = vadd.f32 %v2086_v54, %v573_v37 }
 0x187   : > { %v598_v43 = vmax.f32 %v574_v39, 0.0 }
 0x18c   : > { %v575_v41 = vpop.f32.mrf.mxu1 }
 0x18d   : > { %v576_v42 = vadd.f32 %v2086_v54, %v575_v41 }
 0x18f   : > { %v599_v44 = vmax.f32 %v576_v42, 0.0 }
 0x191   : > { %v609_v45 = vpack.c.bf16 %v599_v44, %v598_v43 }
 0x193   : > { %1718 = vmatmul.msk.bf16.gmra.mxu2 %vm514_vm0, %v609_v45 }
 0x194   : > { %v578_v46 = vpop.f32.mrf.mxu1 }
 0x195   : > { %v579_v48 = vadd.f32 %v2086_v54, %v578_v46 }
 0x197   : > { %v600_v52 = vmax.f32 %v579_v48, 0.0 }
 0x19c   : > { %v580_v50 = vpop.f32.mrf.mxu1 }
 0x19d   : > { %v581_v51 = vadd.f32 %v2086_v54, %v580_v50 }
 0x19f   : > { %v601_v53 = vmax.f32 %v581_v51, 0.0 }
 0x1a1   : > { %v610_v55 = vpack.c.bf16 %v601_v53, %v600_v52 }
 0x1a3   : > { %1719 = vmatmul.msk.bf16.gmra.mxu2 %vm514_vm0, %v610_v55  ;;  %v1805_v55 = vld [vmem:[%s2656_s1 + $0x70] sm:$0xff] }
 0x1a4   : > { %v583_v56 = vpop.f32.mrf.mxu1 }
 0x1a5   : > { %v584_v58 = vadd.f32 %v2086_v54, %v583_v56 }
 0x1a7   : > { %v602_v0 = vmax.f32 %v584_v58, 0.0 }
 0x1ac   : > { %v585_v59 = vpop.f32.mrf.mxu1 }
 0x1ad   : > { %v586_v63 = vadd.f32 %v2086_v54, %v585_v59 }
 0x1af   : > { %v603_v1 = vmax.f32 %v586_v63, 0.0 }
 0x1b1   : > { %v611_v2 = vpack.c.bf16 %v603_v1, %v602_v0 }
 0x1b3   : > { %1720 = vmatmul.msk.bf16.gmra.mxu2 %vm514_vm0, %v611_v2 }
 0x1c0   : > { %v666_v4 = vpop.f32.mrf.mxu0 }
 0x1c1   : > { %v667_v7 = vadd.f32 %v2121_v6, %v666_v4 }
 0x1c3   : > { %v2125_v9 = vadd.f32 %v667_v7, %v2006_v60  ;;  %v1806_v60 = vld [vmem:[%s2656_s1 + $0x78] sm:$0xff] }
 0x1c4   : > { %915 = vmatpush.bf16.msrb.mxu1 %v1806_v60 }
 0x1c5   : > { %v722_v13 = vmax.f32 %v2125_v9, 0.0 }
 0x1c8   : > { %v668_v8 = vpop.f32.mrf.mxu0  ;;  %916 = vmatpush.bf16.msrb.mxu1 %v1805_v55 }
 0x1c9   : > { %v669_v54 = vadd.f32 %v2121_v6, %v668_v8 }
 0x1cb   : > { %v2129_v11 = vadd.f32 %v669_v54, %v2009_v62 }
 0x1cd   : > { %v723_v14 = vmax.f32 %v2129_v11, 0.0 }
 0x1cf   : > { %v738_v15 = vpack.c.bf16 %v723_v14, %v722_v13 }
 0x1d1   : > { %1730 = vmatmul.msk.bf16.vlgmr.msrb.gmra.mxu0 %vm514_vm0, %v738_v15 }
 0x1d6   : > { %v671_v16 = vpop.f32.mrf.mxu2 }
 0x1d7   : > { %v672_v18 = vadd.f32 %v2121_v6, %v671_v16 }
 0x1d9   : > { %v2139_v21 = vadd.f32 %v672_v18, %v2015_v3 }
 0x1db   : > { %v724_v23 = vmax.f32 %v2139_v21, 0.0 }
 0x1de   : > { %v673_v20 = vpop.f32.mrf.mxu2 }
 0x1df   : > { %v674_v62 = vadd.f32 %v2121_v6, %v673_v20 }
 0x1e1   : > { %v2143_v22 = vadd.f32 %v674_v62, %v2018_v5 }
 0x1e3   : > { %v725_v25 = vmax.f32 %v2143_v22, 0.0 }
 0x1e5   : > { %v739_v27 = vpack.c.bf16 %v725_v25, %v724_v23 }
 0x1e6   : > { %v676_v28 = vpop.f32.mrf.mxu2 }
 0x1e7   : > { %1731 = vmatmul.msk.bf16.vlgmr.msra.gmra.mxu3 %vm514_vm0, %v739_v27  ;;  %v677_v29 = vadd.f32 %v2121_v6, %v676_v28  ;;  %v2220_v27 = vld [vmem:[%s2657_s2 + $0x3] ss:$0 sm:$0xff] }
 0x1e9   : > { %v2150_v32 = vadd.f32 %v677_v29, %v2024_v10 }
 0x1eb   : > { %v726_v5 = vmax.f32 %v2150_v32, 0.0 }
 0x1ee   : > { %v678_v30 = vpop.f32.mrf.mxu2 }
 0x1ef   : > { %v679_v3 = vadd.f32 %v2121_v6, %v678_v30 }
 0x1f1   : > { %v2154_v34 = vadd.f32 %v679_v3, %v2027_v12  ;;  %v1808_v3 = vld [vmem:[%s2656_s1 + $0x88] sm:$0xff] }
 0x1f2   : > { %1049 = vmatpush.bf16.msrb.mxu2 %v1808_v3 }
 0x1f3   : > { %v727_v35 = vmax.f32 %v2154_v34, 0.0 }
 0x1f5   : > { %v740_v36 = vpack.c.bf16 %v727_v35, %v726_v5  ;;  %v1810_v5 = vld [vmem:[%s2656_s1 + $0x98] sm:$0xff] }
 0x1f6   : > { %v681_v37 = vpop.f32.mrf.mxu2  ;;  %1119 = vmatpush.bf16.msrb.mxu3 %v1810_v5 }
 0x1f7   : > { %1732 = vmatmul.msk.bf16.gmra.mxu3 %vm514_vm0, %v740_v36  ;;  %v682_v39 = vadd.f32 %v2121_v6, %v681_v37 }
 0x1f9   : > { %v2161_v42 = vadd.f32 %v682_v39, %v2033_v17 }
 0x1fb   : > { %v728_v12 = vmax.f32 %v2161_v42, 0.0 }
 0x1fe   : > { %v683_v41 = vpop.f32.mrf.mxu2 }
 0x1ff   : > { %v684_v10 = vadd.f32 %v2121_v6, %v683_v41 }
 0x201   : > { %v2165_v43 = vadd.f32 %v684_v10, %v2036_v19 }
 0x203   : > { %v729_v44 = vmax.f32 %v2165_v43, 0.0 }
 0x205   : > { %v741_v45 = vpack.c.bf16 %v729_v44, %v728_v12 }
 0x206   : > { %v686_v46 = vpop.f32.mrf.mxu2 }
 0x207   : > { %1733 = vmatmul.msk.bf16.gmra.mxu3 %vm514_vm0, %v741_v45  ;;  %v687_v48 = vadd.f32 %v2121_v6, %v686_v46 }
 0x209   : > { %v2172_v51 = vadd.f32 %v687_v48, %v2042_v24 }
 0x20b   : > { %v730_v19 = vmax.f32 %v2172_v51, 0.0 }
 0x20e   : > { %v688_v50 = vpop.f32.mrf.mxu2 }
 0x20f   : > { %v689_v17 = vadd.f32 %v2121_v6, %v688_v50 }
 0x211   : > { %v2176_v52 = vadd.f32 %v689_v17, %v2045_v26 }
 0x213   : > { %v731_v53 = vmax.f32 %v2176_v52, 0.0 }
 0x215   : > { %v742_v56 = vpack.c.bf16 %v731_v53, %v730_v19 }
 0x216   : > { %v691_v57 = vpop.f32.mrf.mxu2 }
 0x217   : > { %1734 = vmatmul.msk.bf16.gmra.mxu3 %vm514_vm0, %v742_v56  ;;  %v692_v24 = vadd.f32 %v2121_v6, %v691_v57 }
 0x219   : > { %v2186_v59 = vadd.f32 %v692_v24, %v2051_v31 }
 0x21b   : > { %v732_v63 = vmax.f32 %v2186_v59, 0.0 }
 0x21e   : > { %v693_v58 = vpop.f32.mrf.mxu2 }
 0x21f   : > { %v694_v26 = vadd.f32 %v2121_v6, %v693_v58 }
 0x221   : > { %v2190_v61 = vadd.f32 %v694_v26, %v2054_v33 }
 0x223   : > { %v733_v0 = vmax.f32 %v2190_v61, 0.0 }
 0x225   : > { %v743_v1 = vpack.c.bf16 %v733_v0, %v732_v63  ;;  %v1807_v0 = vld [vmem:[%s2656_s1 + $0x80] sm:$0xff] }
 0x226   : > { %v696_v2 = vpop.f32.mrf.mxu2  ;;  %1050 = vmatpush.bf16.msrb.mxu2 %v1807_v0 }
 0x227   : > { %1735 = vmatmul.msk.bf16.gmra.mxu3 %vm514_vm0, %v743_v1  ;;  %v697_v4 = vadd.f32 %v2121_v6, %v696_v2  ;;  %v1809_v1 = vld [vmem:[%s2656_s1 + $0x90] sm:$0xff] }
 0x228   : > { %1120 = vmatpush.bf16.msrb.mxu3 %v1809_v1 }
 0x229   : > { %v2197_v8 = vadd.f32 %v697_v4, %v2060_v38 }
 0x22b   : > { %v734_v33 = vmax.f32 %v2197_v8, 0.0 }
 0x22e   : > { %v698_v7 = vpop.f32.mrf.mxu2 }
 0x22f   : > { %v699_v31 = vadd.f32 %v2121_v6, %v698_v7 }
 0x231   : > { %v2201_v54 = vadd.f32 %v699_v31, %v2063_v40 }
 0x233   : > { %v735_v13 = vmax.f32 %v2201_v54, 0.0 }
 0x235   : > { %v744_v14 = vpack.c.bf16 %v735_v13, %v734_v33 }
 0x236   : > { %v701_v15 = vpop.f32.mrf.mxu2 }
 0x237   : > { %1736 = vmatmul.msk.bf16.gmra.mxu3 %vm514_vm0, %v744_v14  ;;  %v702_v16 = vadd.f32 %v2121_v6, %v701_v15 }
 0x239   : > { %v2208_v60 = vadd.f32 %v702_v16, %v2075_v47 }
 0x23b   : > { %v736_v40 = vmax.f32 %v2208_v60, 0.0 }
 0x23e   : > { %v703_v18 = vpop.f32.mrf.mxu2 }
 0x23f   : > { %v704_v38 = vadd.f32 %v2121_v6, %v703_v18 }
 0x241   : > { %v2212_v20 = vadd.f32 %v704_v38, %v2078_v49 }
 0x243   : > { %v737_v62 = vmax.f32 %v2212_v20, 0.0 }
 0x245   : > { %v745_v23 = vpack.c.bf16 %v737_v62, %v736_v40 }
 0x247   : > { %1737 = vmatmul.msk.bf16.gmra.mxu3 %vm514_vm0, %v745_v23 }
 0x24e   : > { %v800_v25 = vpop.f32.mrf.mxu0 }
 0x24f   : > { %v801_v47 = vadd.f32 %v2220_v27, %v800_v25 }
 0x251   : > { %v840_v49 = vmax.f32 %v801_v47, 0.0 }
 0x256   : > { %v802_v28 = vpop.f32.mrf.mxu0 }
 0x257   : > { %v803_v6 = vadd.f32 %v2220_v27, %v802_v28 }
 0x259   : > { %v841_v29 = vmax.f32 %v803_v6, 0.0 }
 0x25b   : > { %v856_v30 = vpack.c.bf16 %v841_v29, %v840_v49 }
 0x25d   : > { %1747 = vmatmul.msk.bf16.vlgmr.msrb.gmra.mxu1 %vm514_vm0, %v856_v30 }
 0x26a   : > { %v805_v35 = vpop.f32.mrf.mxu3 }
 0x26b   : > { %v806_v36 = vadd.f32 %v2220_v27, %v805_v35 }
 0x26d   : > { %v842_v41 = vmax.f32 %v806_v36, 0.0 }
 0x272   : > { %v807_v37 = vpop.f32.mrf.mxu3 }
 0x273   : > { %v808_v39 = vadd.f32 %v2220_v27, %v807_v37 }
 0x275   : > { %v843_v10 = vmax.f32 %v808_v39, 0.0 }
 0x277   : > { %v857_v12 = vpack.c.bf16 %v843_v10, %v842_v41  ;;  %v2261_v10 = vld [vmem:[%s2657_s2 + $0x4] ss:$0 sm:$0xff] }
 0x279   : > { %1748 = vmatmul.msk.bf16.gmra.mxu1 %vm514_vm0, %v857_v12 }
 0x27a   : > { %v810_v44 = vpop.f32.mrf.mxu3 }
 0x27b   : > { %v811_v45 = vadd.f32 %v2220_v27, %v810_v44 }
 0x27d   : > { %v844_v50 = vmax.f32 %v811_v45, 0.0 }
 0x282   : > { %v812_v46 = vpop.f32.mrf.mxu3 }
 0x283   : > { %v813_v48 = vadd.f32 %v2220_v27, %v812_v46 }
 0x285   : > { %v845_v17 = vmax.f32 %v813_v48, 0.0 }
 0x287   : > { %v858_v19 = vpack.c.bf16 %v845_v17, %v844_v50 }
 0x289   : > { %1749 = vmatmul.msk.bf16.gmra.mxu1 %vm514_vm0, %v858_v19 }
 0x28a   : > { %v815_v53 = vpop.f32.mrf.mxu3 }
 0x28b   : > { %v816_v55 = vadd.f32 %v2220_v27, %v815_v53 }
 0x28d   : > { %v846_v24 = vmax.f32 %v816_v55, 0.0 }
 0x292   : > { %v817_v56 = vpop.f32.mrf.mxu3 }
 0x293   : > { %v818_v57 = vadd.f32 %v2220_v27, %v817_v56 }
 0x295   : > { %v847_v58 = vmax.f32 %v818_v57, 0.0 }
 0x297   : > { %v859_v26 = vpack.c.bf16 %v847_v58, %v846_v24 }
 0x299   : > { %1750 = vmatmul.msk.bf16.gmra.mxu1 %vm514_vm0, %v859_v26 }
 0x29a   : > { %v820_v63 = vpop.f32.mrf.mxu3 }
 0x29b   : > { %v821_v2 = vadd.f32 %v2220_v27, %v820_v63 }
 0x29d   : > { %v848_v31 = vmax.f32 %v821_v2, 0.0 }
 0x2a2   : > { %v822_v4 = vpop.f32.mrf.mxu3 }
 0x2a3   : > { %v823_v7 = vadd.f32 %v2220_v27, %v822_v4 }
 0x2a5   : > { %v849_v33 = vmax.f32 %v823_v7, 0.0 }
 0x2a7   : > { %v860_v13 = vpack.c.bf16 %v849_v33, %v848_v31 }
 0x2a9   : > { %1751 = vmatmul.msk.bf16.gmra.mxu1 %vm514_vm0, %v860_v13 }
 0x2aa   : > { %v825_v14 = vpop.f32.mrf.mxu3 }
 0x2ab   : > { %v826_v15 = vadd.f32 %v2220_v27, %v825_v14 }
 0x2ad   : > { %v850_v38 = vmax.f32 %v826_v15, 0.0 }
 0x2b2   : > { %v827_v16 = vpop.f32.mrf.mxu3 }
 0x2b3   : > { %v828_v18 = vadd.f32 %v2220_v27, %v827_v16 }
 0x2b5   : > { %v851_v40 = vmax.f32 %v828_v18, 0.0 }
 0x2b7   : > { %v861_v62 = vpack.c.bf16 %v851_v40, %v850_v38 }
 0x2b9   : > { %1752 = vmatmul.msk.bf16.gmra.mxu1 %vm514_vm0, %v861_v62 }
 0x2ba   : > { %v830_v23 = vpop.f32.mrf.mxu3 }
 0x2bb   : > { %v831_v25 = vadd.f32 %v2220_v27, %v830_v23 }
 0x2bd   : > { %v852_v6 = vmax.f32 %v831_v25, 0.0 }
 0x2c2   : > { %v832_v47 = vpop.f32.mrf.mxu3 }
 0x2c3   : > { %v833_v28 = vadd.f32 %v2220_v27, %v832_v47 }
 0x2c5   : > { %v853_v49 = vmax.f32 %v833_v28, 0.0 }
 0x2c7   : > { %v862_v29 = vpack.c.bf16 %v853_v49, %v852_v6 }
 0x2c9   : > { %1753 = vmatmul.msk.bf16.gmra.mxu1 %vm514_vm0, %v862_v29 }
 0x2ca   : > { %v835_v30 = vpop.f32.mrf.mxu3 }
 0x2cb   : > { %v836_v3 = vadd.f32 %v2220_v27, %v835_v30 }
 0x2cd   : > { %v854_v36 = vmax.f32 %v836_v3, 0.0 }
 0x2d2   : > { %v837_v5 = vpop.f32.mrf.mxu3 }
 0x2d3   : > { %v838_v35 = vadd.f32 %v2220_v27, %v837_v5 }
 0x2d5   : > { %v855_v37 = vmax.f32 %v838_v35, 0.0 }
 0x2d7   : > { %v863_v39 = vpack.c.bf16 %v855_v37, %v854_v36 }
 0x2d9   : > { %1754 = vmatmul.msk.bf16.gmra.mxu1 %vm514_vm0, %v863_v39 }
 0x2da   : > { %v918_v41 = vpop.f32.mrf.mxu1 }
 0x2db   : > { %v919_v12 = vadd.f32 %v2261_v10, %v918_v41 }
 0x2dd   : > { %v958_v45 = vadd.f32 %v919_v12, %v2125_v9 }
 0x2df   : > { %v974_v48 = vmax.f32 %v958_v45, 0.0 }
 0x2e2   : > { %v920_v44 = vpop.f32.mrf.mxu1 }
 0x2e3   : > { %v921_v46 = vadd.f32 %v2261_v10, %v920_v44 }
 0x2e5   : > { %v959_v27 = vadd.f32 %v921_v46, %v2129_v11 }
 0x2e7   : > { %v975_v50 = vmax.f32 %v959_v27, 0.0 }
 0x2e9   : > { %v990_v17 = vpack.c.bf16 %v975_v50, %v974_v48 }
 0x2eb   : > { %1764 = vmatmul.msk.bf16.vlgmr.msrb.gmra.mxu2 %vm514_vm0, %v990_v17  ;;  %1781 = vmatmul.msk.bf16.vlgmr.msrb.gmra.mxu3 %vm514_vm0, %v990_v17 }
 0x2f6   : > { %v923_v19 = vpop.f32.mrf.mxu1 }
 0x2f7   : > { %v924_v53 = vadd.f32 %v2261_v10, %v923_v19 }
 0x2f9   : > { %v960_v56 = vadd.f32 %v924_v53, %v2139_v21 }
 0x2fb   : > { %v976_v24 = vmax.f32 %v960_v56, 0.0 }
 0x2fe   : > { %v925_v55 = vpop.f32.mrf.mxu1 }
 0x2ff   : > { %v926_v57 = vadd.f32 %v2261_v10, %v925_v55  ;;  %v2317_v55 = vld [vmem:[%s2657_s2 + $0x5] ss:$0 sm:$0xff] }
 0x301   : > { %v961_v9 = vadd.f32 %v926_v57, %v2143_v22 }
 0x303   : > { %v977_v58 = vmax.f32 %v961_v9, 0.0 }
 0x305   : > { %v991_v11 = vpack.c.bf16 %v977_v58, %v976_v24 }
 0x306   : > { %v928_v26 = vpop.f32.mrf.mxu1 }
 0x307   : > { %1765 = vmatmul.msk.bf16.gmra.mxu2 %vm514_vm0, %v991_v11  ;;  %1782 = vmatmul.msk.bf16.gmra.mxu3 %vm514_vm0, %v991_v11  ;;  %v929_v63 = vadd.f32 %v2261_v10, %v928_v26 }
 0x309   : > { %v962_v1 = vadd.f32 %v929_v63, %v2150_v32 }
 0x30b   : > { %v978_v4 = vmax.f32 %v962_v1, 0.0 }
 0x30e   : > { %v930_v0 = vpop.f32.mrf.mxu1 }
 0x30f   : > { %v931_v2 = vadd.f32 %v2261_v10, %v930_v0 }
 0x311   : > { %v963_v21 = vadd.f32 %v931_v2, %v2154_v34 }
 0x313   : > { %v979_v7 = vmax.f32 %v963_v21, 0.0 }
 0x315   : > { %v992_v22 = vpack.c.bf16 %v979_v7, %v978_v4 }
 0x316   : > { %v933_v31 = vpop.f32.mrf.mxu1 }
 0x317   : > { %1766 = vmatmul.msk.bf16.gmra.mxu2 %vm514_vm0, %v992_v22  ;;  %1783 = vmatmul.msk.bf16.gmra.mxu3 %vm514_vm0, %v992_v22  ;;  %v934_v33 = vadd.f32 %v2261_v10, %v933_v31 }
 0x319   : > { %v964_v14 = vadd.f32 %v934_v33, %v2161_v42 }
 0x31b   : > { %v980_v16 = vmax.f32 %v964_v14, 0.0 }
 0x31e   : > { %v935_v13 = vpop.f32.mrf.mxu1 }
 0x31f   : > { %v936_v15 = vadd.f32 %v2261_v10, %v935_v13 }
 0x321   : > { %v965_v32 = vadd.f32 %v936_v15, %v2165_v43 }
 0x323   : > { %v981_v18 = vmax.f32 %v965_v32, 0.0 }
 0x325   : > { %v993_v34 = vpack.c.bf16 %v981_v18, %v980_v16 }
 0x326   : > { %v938_v38 = vpop.f32.mrf.mxu1 }
 0x327   : > { %1767 = vmatmul.msk.bf16.gmra.mxu2 %vm514_vm0, %v993_v34  ;;  %1784 = vmatmul.msk.bf16.gmra.mxu3 %vm514_vm0, %v993_v34  ;;  %v939_v40 = vadd.f32 %v2261_v10, %v938_v38 }
 0x329   : > { %v966_v23 = vadd.f32 %v939_v40, %v2172_v51 }
 0x32b   : > { %v982_v47 = vmax.f32 %v966_v23, 0.0 }
 0x32e   : > { %v940_v62 = vpop.f32.mrf.mxu1 }
 0x32f   : > { %v941_v25 = vadd.f32 %v2261_v10, %v940_v62 }
 0x331   : > { %v967_v42 = vadd.f32 %v941_v25, %v2176_v52 }
 0x333   : > { %v983_v28 = vmax.f32 %v967_v42, 0.0 }
 0x335   : > { %v994_v43 = vpack.c.bf16 %v983_v28, %v982_v47 }
 0x336   : > { %v943_v6 = vpop.f32.mrf.mxu1 }
 0x337   : > { %1768 = vmatmul.msk.bf16.gmra.mxu2 %vm514_vm0, %v994_v43  ;;  %1785 = vmatmul.msk.bf16.gmra.mxu3 %vm514_vm0, %v994_v43  ;;  %v944_v49 = vadd.f32 %v2261_v10, %v943_v6 }
 0x339   : > { %v968_v30 = vadd.f32 %v944_v49, %v2186_v59 }
 0x33b   : > { %v984_v5 = vmax.f32 %v968_v30, 0.0 }
 0x33e   : > { %v945_v29 = vpop.f32.mrf.mxu1 }
 0x33f   : > { %v946_v3 = vadd.f32 %v2261_v10, %v945_v29 }
 0x341   : > { %v969_v51 = vadd.f32 %v946_v3, %v2190_v61 }
 0x343   : > { %v985_v35 = vmax.f32 %v969_v51, 0.0 }
 0x345   : > { %v995_v52 = vpack.c.bf16 %v985_v35, %v984_v5 }
 0x346   : > { %v948_v36 = vpop.f32.mrf.mxu1 }
 0x347   : > { %1769 = vmatmul.msk.bf16.gmra.mxu2 %vm514_vm0, %v995_v52  ;;  %1786 = vmatmul.msk.bf16.gmra.mxu3 %vm514_vm0, %v995_v52  ;;  %v949_v37 = vadd.f32 %v2261_v10, %v948_v36 }
 0x349   : > { %v970_v41 = vadd.f32 %v949_v37, %v2197_v8 }
 0x34b   : > { %v986_v44 = vmax.f32 %v970_v41, 0.0 }
 0x34e   : > { %v950_v39 = vpop.f32.mrf.mxu1 }
 0x34f   : > { %v951_v12 = vadd.f32 %v2261_v10, %v950_v39 }
 0x351   : > { %v971_v59 = vadd.f32 %v951_v12, %v2201_v54 }
 0x353   : > { %v987_v61 = vmax.f32 %v971_v59, 0.0 }
 0x355   : > { %v996_v45 = vpack.c.bf16 %v987_v61, %v986_v44 }
 0x356   : > { %v953_v46 = vpop.f32.mrf.mxu1 }
 0x357   : > { %1770 = vmatmul.msk.bf16.gmra.mxu2 %vm514_vm0, %v996_v45  ;;  %1787 = vmatmul.msk.bf16.gmra.mxu3 %vm514_vm0, %v996_v45  ;;  %v954_v27 = vadd.f32 %v2261_v10, %v953_v46 }
 0x359   : > { %v972_v50 = vadd.f32 %v954_v27, %v2208_v60  ;;  %v2322_v60 = vld [vmem:[%s2657_s2 + $0x6] ss:$0 sm:$0xff] }
 0x35b   : > { %v988_v19 = vmax.f32 %v972_v50, 0.0 }
 0x35e   : > { %v955_v48 = vpop.f32.mrf.mxu1 }
 0x35f   : > { %v956_v8 = vadd.f32 %v2261_v10, %v955_v48 }
 0x361   : > { %v973_v17 = vadd.f32 %v956_v8, %v2212_v20 }
 0x363   : > { %v989_v54 = vmax.f32 %v973_v17, 0.0 }
 0x365   : > { %v997_v53 = vpack.c.bf16 %v989_v54, %v988_v19 }
 0x367   : > { %1771 = vmatmul.msk.bf16.gmra.mxu2 %vm514_vm0, %v997_v53  ;;  %1788 = vmatmul.msk.bf16.gmra.mxu3 %vm514_vm0, %v997_v53 }
 0x36e   : > { %v1052_v20 = vpop.f32.mrf.mxu2  ;;  %v1122_v10 = vpop.f32.mrf.mxu3 }
 0x36f   : > { %v1053_v56 = vadd.f32 %v2317_v55, %v1052_v20  ;;  %v1123_v57 = vadd.f32 %v2322_v60, %v1122_v10 }
 0x371   : > { %1162 = vst.msk [vmem:[%s2328_s17] sm:$0xff] %vm514_vm0, %v1053_v56  ;;  %v1194_v9 = vmul.f32 %v1053_v56, %v1053_v56  ;;  %v1210_v24 = vmul.f32 %v1123_v57, %v1123_v57 }
 0x372   : > { %1178 = vst.msk [vmem:[%s2335_s19] sm:$0xff] %vm514_vm0, %v1123_v57 }
 0x373   : > { %v1226_v58 = vadd.f32 %v1210_v24, %v1194_v9 }
 0x375   : > { %v1242_v11 = vmax.f32 %v1226_v58, 1e-12 }
 0x376   : > { %v1054_v26 = vpop.f32.mrf.mxu2  ;;  %v1124_v63 = vpop.f32.mrf.mxu3 }
 0x377   : > { %1871 = vrsqrt.f32 %v1242_v11  ;;  %v1055_v0 = vadd.f32 %v2317_v55, %v1054_v26  ;;  %v1125_v1 = vadd.f32 %v2322_v60, %v1124_v63  ;;  %vm1264_vm2 = vweird.f32 %v1242_v11 }
 0x379   : > { %1163 = vst.msk [vmem:[%s2328_s17 + $0x8] sm:$0xff] %vm514_vm0, %v1055_v0  ;;  %v1195_v2 = vmul.f32 %v1055_v0, %v1055_v0  ;;  %v1211_v21 = vmul.f32 %v1125_v1, %v1125_v1 }
 0x37a   : > { %1179 = vst.msk [vmem:[%s2335_s19 + $0x8] sm:$0xff] %vm514_vm0, %v1125_v1 }
 0x37b   : > { %v1227_v4 = vadd.f32 %v1211_v21, %v1195_v2 }
 0x37d   : > { %v1872_v7 = vpop.eup %1871  ;;  %v1243_v22 = vmax.f32 %v1227_v4, 1e-12 }
 0x37e   : > { %v1259_v31 = vmul.f32 %v1872_v7, %v1242_v11  ;;  %vm1265_vm1 = vweird.f32 %v1872_v7 }
 0x37f   : > { %1873 = vrsqrt.f32 %v1243_v22  ;;  %vm1266_vm3 = vmor %vm1264_vm2, %vm1265_vm1  ;;  %vm1274_vm5 = vweird.f32 %v1243_v22 }
 0x380   : > { %v1260_v33 = vmul.f32 %v1872_v7, %v1259_v31 }
 0x382   : > { %v1261_v13 = vmul.f32 0.5, %v1260_v33 }
 0x384   : > { %v1262_v14 = vsub.f32 1.5, %v1261_v13 }
 0x385   : > { %v1874_v15 = vpop.eup %1873 }
 0x386   : > { %v1263_v32 = vmul.f32 %v1872_v7, %v1262_v14  ;;  %v1269_v16 = vmul.f32 %v1874_v15, %v1243_v22  ;;  %vm1275_vm4 = vweird.f32 %v1874_v15 }
 0x387   : > { %vm1276_vm6 = vmor %vm1274_vm5, %vm1275_vm4 }
 0x388   : > { %v1267_v18 = vsel %vm1266_vm3, %v1872_v7, %v1263_v32  ;;  %v1270_v34 = vmul.f32 %v1874_v15, %v1269_v16 }
 0x389   : > { %v1418_v38 = vmul.f32 %v1267_v18, %v1053_v56  ;;  %v1450_v40 = vmul.f32 %v1267_v18, %v1123_v57 }
 0x38a   : > { %v1271_v62 = vmul.f32 0.5, %v1270_v34  ;;  %v1057_v23 = vpop.f32.mrf.mxu2  ;;  %v1127_v25 = vpop.f32.mrf.mxu3 }
 0x38b   : > { %1434 = vst.msk [vmem:[%s2352_s23] sm:$0xff] %vm514_vm0, %v1418_v38  ;;  %v1058_v42 = vadd.f32 %v2317_v55, %v1057_v23  ;;  %v1128_v47 = vadd.f32 %v2322_v60, %v1127_v25 }
 0x38c   : > { %1466 = vst.msk [vmem:[%s2358_s27] sm:$0xff] %vm514_vm0, %v1450_v40  ;;  %v1272_v28 = vsub.f32 1.5, %v1271_v62 }
 0x38d   : > { %1164 = vst.msk [vmem:[%s2328_s17 + $0x10] sm:$0xff] %vm514_vm0, %v1058_v42  ;;  %v1196_v43 = vmul.f32 %v1058_v42, %v1058_v42  ;;  %v1212_v6 = vmul.f32 %v1128_v47, %v1128_v47 }
 0x38e   : > { %v1273_v49 = vmul.f32 %v1874_v15, %v1272_v28  ;;  %1180 = vst.msk [vmem:[%s2335_s19 + $0x10] sm:$0xff] %vm514_vm0, %v1128_v47 }
 0x38f   : > { %v1228_v29 = vadd.f32 %v1212_v6, %v1196_v43 }
 0x390   : > { %v1277_v30 = vsel %vm1276_vm6, %v1874_v15, %v1273_v49 }
 0x391   : > { %v1419_v3 = vmul.f32 %v1277_v30, %v1055_v0  ;;  %v1451_v51 = vmul.f32 %v1277_v30, %v1125_v1  ;;  %v1244_v5 = vmax.f32 %v1228_v29, 1e-12 }
 0x392   : > { %v1059_v35 = vpop.f32.mrf.mxu2  ;;  %v1129_v52 = vpop.f32.mrf.mxu3 }
 0x393   : > { %1435 = vst.msk [vmem:[%s2352_s23 + $0x8] sm:$0xff] %vm514_vm0, %v1419_v3  ;;  %1875 = vrsqrt.f32 %v1244_v5  ;;  %v2373_v36 = vadd.f32 %v2317_v55, %v1059_v35  ;;  %v2376_v37 = vadd.f32 %v2322_v60, %v1129_v52  ;;  %vm1284_vm8 = vweird.f32 %v1244_v5 }
 0x394   : > { %1467 = vst.msk [vmem:[%s2358_s27 + $0x8] sm:$0xff] %vm514_vm0, %v1451_v51 }
 0x395   : > { %1165 = vst.msk [vmem:[%s2328_s17 + $0x18] sm:$0xff] %vm514_vm0, %v2373_v36  ;;  %v1197_v39 = vmul.f32 %v2373_v36, %v2373_v36  ;;  %v1213_v41 = vmul.f32 %v2376_v37, %v2376_v37 }
 0x396   : > { %1181 = vst.msk [vmem:[%s2335_s19 + $0x18] sm:$0xff] %vm514_vm0, %v2376_v37 }
 0x397   : > { %v1229_v12 = vadd.f32 %v1213_v41, %v1197_v39 }
 0x399   : > { %v1876_v59 = vpop.eup %1875  ;;  %v1245_v44 = vmax.f32 %v1229_v12, 1e-12 }
 0x39a   : > { %v1279_v61 = vmul.f32 %v1876_v59, %v1244_v5  ;;  %v1062_v45 = vpop.f32.mrf.mxu2  ;;  %v1132_v46 = vpop.f32.mrf.mxu3  ;;  %vm1285_vm7 = vweird.f32 %v1876_v59 }
 0x39b   : > { %1877 = vrsqrt.f32 %v1245_v44  ;;  %v2391_v27 = vadd.f32 %v2317_v55, %v1062_v45  ;;  %v2394_v48 = vadd.f32 %v2322_v60, %v1132_v46  ;;  %vm1286_vm9 = vmor %vm1284_vm8, %vm1285_vm7  ;;  %vm1294_vm11 = vweird.f32 %v1245_v44 }
 0x39c   : > { %v1280_v50 = vmul.f32 %v1876_v59, %v1279_v61 }
 0x39d   : > { %1166 = vst.msk [vmem:[%s2328_s17 + $0x20] sm:$0xff] %vm514_vm0, %v2391_v27  ;;  %v1198_v8 = vmul.f32 %v2391_v27, %v2391_v27  ;;  %v1214_v17 = vmul.f32 %v2394_v48, %v2394_v48 }
 0x39e   : > { %v1281_v19 = vmul.f32 0.5, %v1280_v50  ;;  %1182 = vst.msk [vmem:[%s2335_s19 + $0x20] sm:$0xff] %vm514_vm0, %v2394_v48 }
 0x39f   : > { %v1230_v54 = vadd.f32 %v1214_v17, %v1198_v8 }
 0x3a0   : > { %v1282_v53 = vsub.f32 1.5, %v1281_v19 }
 0x3a1   : > { %v1878_v20 = vpop.eup %1877  ;;  %v1246_v10 = vmax.f32 %v1230_v54, 1e-12 }
 0x3a2   : > { %v1283_v56 = vmul.f32 %v1876_v59, %v1282_v53  ;;  %v1289_v57 = vmul.f32 %v1878_v20, %v1245_v44  ;;  %v1064_v9 = vpop.f32.mrf.mxu2  ;;  %v1134_v24 = vpop.f32.mrf.mxu3  ;;  %vm1295_vm10 = vweird.f32 %v1878_v20 }
 0x3a3   : > { %1879 = vrsqrt.f32 %v1246_v10  ;;  %v2407_v58 = vadd.f32 %v2317_v55, %v1064_v9  ;;  %v2410_v11 = vadd.f32 %v2322_v60, %v1134_v24  ;;  %vm1296_vm12 = vmor %vm1294_vm11, %vm1295_vm10  ;;  %vm1304_vm14 = vweird.f32 %v1246_v10 }
 0x3a4   : > { %v1287_v26 = vsel %vm1286_vm9, %v1876_v59, %v1283_v56  ;;  %v1290_v63 = vmul.f32 %v1878_v20, %v1289_v57 }
 0x3a5   : > { %v1420_v0 = vmul.f32 %v1287_v26, %v1058_v42  ;;  %v1452_v1 = vmul.f32 %v1287_v26, %v1128_v47  ;;  %1167 = vst.msk [vmem:[%s2328_s17 + $0x28] sm:$0xff] %vm514_vm0, %v2407_v58  ;;  %v1199_v2 = vmul.f32 %v2407_v58, %v2407_v58  ;;  %v1215_v21 = vmul.f32 %v2410_v11, %v2410_v11 }
 0x3a6   : > { %v1291_v4 = vmul.f32 0.5, %v1290_v63  ;;  %1183 = vst.msk [vmem:[%s2335_s19 + $0x28] sm:$0xff] %vm514_vm0, %v2410_v11 }
 0x3a7   : > { %1436 = vst.msk [vmem:[%s2352_s23 + $0x10] sm:$0xff] %vm514_vm0, %v1420_v0  ;;  %v1231_v7 = vadd.f32 %v1215_v21, %v1199_v2 }
 0x3a8   : > { %1468 = vst.msk [vmem:[%s2358_s27 + $0x10] sm:$0xff] %vm514_vm0, %v1452_v1  ;;  %v1292_v22 = vsub.f32 1.5, %v1291_v4 }
 0x3a9   : > { %v1880_v31 = vpop.eup %1879  ;;  %v1247_v33 = vmax.f32 %v1231_v7, 1e-12 }
 0x3aa   : > { %v1293_v13 = vmul.f32 %v1878_v20, %v1292_v22  ;;  %v1299_v14 = vmul.f32 %v1880_v31, %v1246_v10  ;;  %v1067_v15 = vpop.f32.mrf.mxu2  ;;  %v1137_v32 = vpop.f32.mrf.mxu3  ;;  %vm1305_vm13 = vweird.f32 %v1880_v31 }
 0x3ab   : > { %1881 = vrsqrt.f32 %v1247_v33  ;;  %v2427_v16 = vadd.f32 %v2317_v55, %v1067_v15  ;;  %v2430_v18 = vadd.f32 %v2322_v60, %v1137_v32  ;;  %vm1306_vm15 = vmor %vm1304_vm14, %vm1305_vm13  ;;  %vm1314_vm2 = vweird.f32 %v1247_v33 }
 0x3ac   : > { %v1297_v34 = vsel %vm1296_vm12, %v1878_v20, %v1293_v13  ;;  %v1300_v38 = vmul.f32 %v1880_v31, %v1299_v14 }
 0x3ad   : > { %v1421_v40 = vmul.f32 %v1297_v34, %v2373_v36  ;;  %v1453_v62 = vmul.f32 %v1297_v34, %v2376_v37  ;;  %1168 = vst.msk [vmem:[%s2328_s17 + $0x30] sm:$0xff] %vm514_vm0, %v2427_v16  ;;  %v1200_v23 = vmul.f32 %v2427_v16, %v2427_v16  ;;  %v1216_v25 = vmul.f32 %v2430_v18, %v2430_v18 }
 0x3ae   : > { %v1301_v42 = vmul.f32 0.5, %v1300_v38  ;;  %1184 = vst.msk [vmem:[%s2335_s19 + $0x30] sm:$0xff] %vm514_vm0, %v2430_v18 }
 0x3af   : > { %1437 = vst.msk [vmem:[%s2352_s23 + $0x18] sm:$0xff] %vm514_vm0, %v1421_v40  ;;  %v1232_v47 = vadd.f32 %v1216_v25, %v1200_v23 }
 0x3b0   : > { %1469 = vst.msk [vmem:[%s2358_s27 + $0x18] sm:$0xff] %vm514_vm0, %v1453_v62  ;;  %v1302_v28 = vsub.f32 1.5, %v1301_v42 }
 0x3b1   : > { %v1882_v43 = vpop.eup %1881  ;;  %v1248_v6 = vmax.f32 %v1232_v47, 1e-12 }
 0x3b2   : > { %v1303_v49 = vmul.f32 %v1880_v31, %v1302_v28  ;;  %v1309_v29 = vmul.f32 %v1882_v43, %v1247_v33  ;;  %v1069_v30 = vpop.f32.mrf.mxu2  ;;  %v1139_v3 = vpop.f32.mrf.mxu3  ;;  %vm1315_vm1 = vweird.f32 %v1882_v43 }
 0x3b3   : > { %1883 = vrsqrt.f32 %v1248_v6  ;;  %v2449_v51 = vadd.f32 %v2317_v55, %v1069_v30  ;;  %v2452_v5 = vadd.f32 %v2322_v60, %v1139_v3  ;;  %vm1316_vm3 = vmor %vm1314_vm2, %vm1315_vm1  ;;  %vm1324_vm5 = vweird.f32 %v1248_v6 }
 0x3b4   : > { %v1307_v35 = vsel %vm1306_vm15, %v1880_v31, %v1303_v49  ;;  %v1310_v52 = vmul.f32 %v1882_v43, %v1309_v29 }
 0x3b5   : > { %v1422_v36 = vmul.f32 %v1307_v35, %v2391_v27  ;;  %v1454_v37 = vmul.f32 %v1307_v35, %v2394_v48  ;;  %1169 = vst.msk [vmem:[%s2328_s17 + $0x38] sm:$0xff] %vm514_vm0, %v2449_v51  ;;  %v1201_v39 = vmul.f32 %v2449_v51, %v2449_v51  ;;  %v1217_v41 = vmul.f32 %v2452_v5, %v2452_v5 }
 0x3b6   : > { %v1311_v12 = vmul.f32 0.5, %v1310_v52  ;;  %1185 = vst.msk [vmem:[%s2335_s19 + $0x38] sm:$0xff] %vm514_vm0, %v2452_v5 }
 0x3b7   : > { %1438 = vst.msk [vmem:[%s2352_s23 + $0x20] sm:$0xff] %vm514_vm0, %v1422_v36  ;;  %v1233_v59 = vadd.f32 %v1217_v41, %v1201_v39 }
 0x3b8   : > { %1470 = vst.msk [vmem:[%s2358_s27 + $0x20] sm:$0xff] %vm514_vm0, %v1454_v37  ;;  %v1312_v44 = vsub.f32 1.5, %v1311_v12 }
 0x3b9   : > { %v1884_v61 = vpop.eup %1883  ;;  %v1249_v45 = vmax.f32 %v1233_v59, 1e-12 }
 0x3ba   : > { %v1313_v46 = vmul.f32 %v1882_v43, %v1312_v44  ;;  %v1319_v27 = vmul.f32 %v1884_v61, %v1248_v6  ;;  %v1072_v48 = vpop.f32.mrf.mxu2  ;;  %v1142_v50 = vpop.f32.mrf.mxu3  ;;  %vm1325_vm4 = vweird.f32 %v1884_v61 }
 0x3bb   : > { %1885 = vrsqrt.f32 %v1249_v45  ;;  %v2471_v8 = vadd.f32 %v2317_v55, %v1072_v48  ;;  %v2474_v17 = vadd.f32 %v2322_v60, %v1142_v50  ;;  %vm1326_vm6 = vmor %vm1324_vm5, %vm1325_vm4  ;;  %vm1334_vm8 = vweird.f32 %v1249_v45 }
 0x3bc   : > { %v1317_v19 = vsel %vm1316_vm3, %v1882_v43, %v1313_v46  ;;  %v1320_v54 = vmul.f32 %v1884_v61, %v1319_v27 }
 0x3bd   : > { %v1423_v53 = vmul.f32 %v1317_v19, %v2407_v58  ;;  %v1455_v20 = vmul.f32 %v1317_v19, %v2410_v11  ;;  %1170 = vst.msk [vmem:[%s2328_s17 + $0x40] sm:$0xff] %vm514_vm0, %v2471_v8  ;;  %v1202_v10 = vmul.f32 %v2471_v8, %v2471_v8  ;;  %v1218_v56 = vmul.f32 %v2474_v17, %v2474_v17 }
 0x3be   : > { %v1321_v57 = vmul.f32 0.5, %v1320_v54  ;;  %1186 = vst.msk [vmem:[%s2335_s19 + $0x40] sm:$0xff] %vm514_vm0, %v2474_v17 }
 0x3bf   : > { %1439 = vst.msk [vmem:[%s2352_s23 + $0x28] sm:$0xff] %vm514_vm0, %v1423_v53  ;;  %v1234_v9 = vadd.f32 %v1218_v56, %v1202_v10 }
 0x3c0   : > { %1471 = vst.msk [vmem:[%s2358_s27 + $0x28] sm:$0xff] %vm514_vm0, %v1455_v20  ;;  %v1322_v24 = vsub.f32 1.5, %v1321_v57 }
 0x3c1   : > { %v1886_v58 = vpop.eup %1885  ;;  %v1250_v11 = vmax.f32 %v1234_v9, 1e-12 }
 0x3c2   : > { %v1323_v26 = vmul.f32 %v1884_v61, %v1322_v24  ;;  %v1329_v63 = vmul.f32 %v1886_v58, %v1249_v45  ;;  %v1074_v0 = vpop.f32.mrf.mxu2  ;;  %v1144_v1 = vpop.f32.mrf.mxu3  ;;  %vm1335_vm7 = vweird.f32 %v1886_v58 }
 0x3c3   : > { %1887 = vrsqrt.f32 %v1250_v11  ;;  %v2493_v2 = vadd.f32 %v2317_v55, %v1074_v0  ;;  %v2496_v21 = vadd.f32 %v2322_v60, %v1144_v1  ;;  %vm1336_vm9 = vmor %vm1334_vm8, %vm1335_vm7  ;;  %vm1344_vm11 = vweird.f32 %v1250_v11 }
 0x3c4   : > { %v1327_v4 = vsel %vm1326_vm6, %v1884_v61, %v1323_v26  ;;  %v1330_v7 = vmul.f32 %v1886_v58, %v1329_v63 }
 0x3c5   : > { %v1424_v22 = vmul.f32 %v1327_v4, %v2427_v16  ;;  %v1456_v31 = vmul.f32 %v1327_v4, %v2430_v18  ;;  %1171 = vst.msk [vmem:[%s2328_s17 + $0x48] sm:$0xff] %vm514_vm0, %v2493_v2  ;;  %v1203_v33 = vmul.f32 %v2493_v2, %v2493_v2  ;;  %v1219_v13 = vmul.f32 %v2496_v21, %v2496_v21 }
 0x3c6   : > { %v1331_v14 = vmul.f32 0.5, %v1330_v7  ;;  %1187 = vst.msk [vmem:[%s2335_s19 + $0x48] sm:$0xff] %vm514_vm0, %v2496_v21 }
 0x3c7   : > { %1440 = vst.msk [vmem:[%s2352_s23 + $0x30] sm:$0xff] %vm514_vm0, %v1424_v22  ;;  %v1235_v15 = vadd.f32 %v1219_v13, %v1203_v33 }
 0x3c8   : > { %1472 = vst.msk [vmem:[%s2358_s27 + $0x30] sm:$0xff] %vm514_vm0, %v1456_v31  ;;  %v1332_v32 = vsub.f32 1.5, %v1331_v14 }
 0x3c9   : > { %v1888_v16 = vpop.eup %1887  ;;  %v1251_v18 = vmax.f32 %v1235_v15, 1e-12 }
 0x3ca   : > { %v1333_v34 = vmul.f32 %v1886_v58, %v1332_v32  ;;  %v1339_v38 = vmul.f32 %v1888_v16, %v1250_v11  ;;  %v1077_v40 = vpop.f32.mrf.mxu2  ;;  %v1147_v62 = vpop.f32.mrf.mxu3  ;;  %vm1345_vm10 = vweird.f32 %v1888_v16 }
 0x3cb   : > { %1889 = vrsqrt.f32 %v1251_v18  ;;  %v2515_v23 = vadd.f32 %v2317_v55, %v1077_v40  ;;  %v2518_v25 = vadd.f32 %v2322_v60, %v1147_v62  ;;  %vm1346_vm12 = vmor %vm1344_vm11, %vm1345_vm10  ;;  %vm1354_vm14 = vweird.f32 %v1251_v18 }
 0x3cc   : > { %v1337_v42 = vsel %vm1336_vm9, %v1886_v58, %v1333_v34  ;;  %v1340_v47 = vmul.f32 %v1888_v16, %v1339_v38 }
 0x3cd   : > { %v1425_v28 = vmul.f32 %v1337_v42, %v2449_v51  ;;  %v1457_v43 = vmul.f32 %v1337_v42, %v2452_v5  ;;  %1172 = vst.msk [vmem:[%s2328_s17 + $0x50] sm:$0xff] %vm514_vm0, %v2515_v23  ;;  %v1204_v6 = vmul.f32 %v2515_v23, %v2515_v23  ;;  %v1220_v49 = vmul.f32 %v2518_v25, %v2518_v25 }
 0x3ce   : > { %v1341_v29 = vmul.f32 0.5, %v1340_v47  ;;  %1188 = vst.msk [vmem:[%s2335_s19 + $0x50] sm:$0xff] %vm514_vm0, %v2518_v25 }
 0x3cf   : > { %1441 = vst.msk [vmem:[%s2352_s23 + $0x38] sm:$0xff] %vm514_vm0, %v1425_v28  ;;  %v1236_v30 = vadd.f32 %v1220_v49, %v1204_v6 }
 0x3d0   : > { %1473 = vst.msk [vmem:[%s2358_s27 + $0x38] sm:$0xff] %vm514_vm0, %v1457_v43  ;;  %v1342_v3 = vsub.f32 1.5, %v1341_v29 }
 0x3d1   : > { %v1890_v51 = vpop.eup %1889  ;;  %v1252_v5 = vmax.f32 %v1236_v30, 1e-12 }
 0x3d2   : > { %v1343_v35 = vmul.f32 %v1888_v16, %v1342_v3  ;;  %v1349_v52 = vmul.f32 %v1890_v51, %v1251_v18  ;;  %v1079_v36 = vpop.f32.mrf.mxu2  ;;  %v1149_v37 = vpop.f32.mrf.mxu3  ;;  %vm1355_vm13 = vweird.f32 %v1890_v51 }
 0x3d3   : > { %1891 = vrsqrt.f32 %v1252_v5  ;;  %v2537_v39 = vadd.f32 %v2317_v55, %v1079_v36  ;;  %v2540_v41 = vadd.f32 %v2322_v60, %v1149_v37  ;;  %vm1356_vm15 = vmor %vm1354_vm14, %vm1355_vm13  ;;  %vm1364_vm2 = vweird.f32 %v1252_v5 }
 0x3d4   : > { %v1347_v12 = vsel %vm1346_vm12, %v1888_v16, %v1343_v35  ;;  %v1350_v59 = vmul.f32 %v1890_v51, %v1349_v52 }
 0x3d5   : > { %v1426_v44 = vmul.f32 %v1347_v12, %v2471_v8  ;;  %v1458_v61 = vmul.f32 %v1347_v12, %v2474_v17  ;;  %1173 = vst.msk [vmem:[%s2328_s17 + $0x58] sm:$0xff] %vm514_vm0, %v2537_v39  ;;  %v1205_v45 = vmul.f32 %v2537_v39, %v2537_v39  ;;  %v1221_v46 = vmul.f32 %v2540_v41, %v2540_v41 }
 0x3d6   : > { %v1351_v27 = vmul.f32 0.5, %v1350_v59  ;;  %1189 = vst.msk [vmem:[%s2335_s19 + $0x58] sm:$0xff] %vm514_vm0, %v2540_v41 }
 0x3d7   : > { %1442 = vst.msk [vmem:[%s2352_s23 + $0x40] sm:$0xff] %vm514_vm0, %v1426_v44  ;;  %v1237_v48 = vadd.f32 %v1221_v46, %v1205_v45 }
 0x3d8   : > { %1474 = vst.msk [vmem:[%s2358_s27 + $0x40] sm:$0xff] %vm514_vm0, %v1458_v61  ;;  %v1352_v50 = vsub.f32 1.5, %v1351_v27 }
 0x3d9   : > { %v1892_v8 = vpop.eup %1891  ;;  %v1253_v17 = vmax.f32 %v1237_v48, 1e-12 }
 0x3da   : > { %v1353_v19 = vmul.f32 %v1890_v51, %v1352_v50  ;;  %v1359_v54 = vmul.f32 %v1892_v8, %v1252_v5  ;;  %v1082_v53 = vpop.f32.mrf.mxu2  ;;  %v1152_v20 = vpop.f32.mrf.mxu3  ;;  %vm1365_vm1 = vweird.f32 %v1892_v8 }
 0x3db   : > { %1893 = vrsqrt.f32 %v1253_v17  ;;  %v2559_v10 = vadd.f32 %v2317_v55, %v1082_v53  ;;  %v2562_v56 = vadd.f32 %v2322_v60, %v1152_v20  ;;  %vm1366_vm3 = vmor %vm1364_vm2, %vm1365_vm1  ;;  %vm1374_vm5 = vweird.f32 %v1253_v17 }
 0x3dc   : > { %v1357_v57 = vsel %vm1356_vm15, %v1890_v51, %v1353_v19  ;;  %v1360_v9 = vmul.f32 %v1892_v8, %v1359_v54 }
 0x3dd   : > { %v1427_v24 = vmul.f32 %v1357_v57, %v2493_v2  ;;  %v1459_v58 = vmul.f32 %v1357_v57, %v2496_v21  ;;  %1174 = vst.msk [vmem:[%s2328_s17 + $0x60] sm:$0xff] %vm514_vm0, %v2559_v10  ;;  %v1206_v11 = vmul.f32 %v2559_v10, %v2559_v10  ;;  %v1222_v26 = vmul.f32 %v2562_v56, %v2562_v56 }
 0x3de   : > { %v1361_v63 = vmul.f32 0.5, %v1360_v9  ;;  %1190 = vst.msk [vmem:[%s2335_s19 + $0x60] sm:$0xff] %vm514_vm0, %v2562_v56 }
 0x3df   : > { %1443 = vst.msk [vmem:[%s2352_s23 + $0x48] sm:$0xff] %vm514_vm0, %v1427_v24  ;;  %v1238_v0 = vadd.f32 %v1222_v26, %v1206_v11 }
 0x3e0   : > { %1475 = vst.msk [vmem:[%s2358_s27 + $0x48] sm:$0xff] %vm514_vm0, %v1459_v58  ;;  %v1362_v1 = vsub.f32 1.5, %v1361_v63 }
 0x3e1   : > { %v1894_v2 = vpop.eup %1893  ;;  %v1254_v21 = vmax.f32 %v1238_v0, 1e-12 }
 0x3e2   : > { %v1363_v4 = vmul.f32 %v1892_v8, %v1362_v1  ;;  %v1369_v7 = vmul.f32 %v1894_v2, %v1253_v17  ;;  %v1084_v22 = vpop.f32.mrf.mxu2  ;;  %v1154_v31 = vpop.f32.mrf.mxu3  ;;  %vm1375_vm4 = vweird.f32 %v1894_v2 }
 0x3e3   : > { %1895 = vrsqrt.f32 %v1254_v21  ;;  %v2581_v33 = vadd.f32 %v2317_v55, %v1084_v22  ;;  %v2584_v13 = vadd.f32 %v2322_v60, %v1154_v31  ;;  %vm1376_vm6 = vmor %vm1374_vm5, %vm1375_vm4  ;;  %vm1384_vm8 = vweird.f32 %v1254_v21 }
 0x3e4   : > { %v1367_v14 = vsel %vm1366_vm3, %v1892_v8, %v1363_v4  ;;  %v1370_v15 = vmul.f32 %v1894_v2, %v1369_v7 }
 0x3e5   : > { %v1428_v32 = vmul.f32 %v1367_v14, %v2515_v23  ;;  %v1460_v16 = vmul.f32 %v1367_v14, %v2518_v25  ;;  %1175 = vst.msk [vmem:[%s2328_s17 + $0x68] sm:$0xff] %vm514_vm0, %v2581_v33  ;;  %v1207_v18 = vmul.f32 %v2581_v33, %v2581_v33  ;;  %v1223_v34 = vmul.f32 %v2584_v13, %v2584_v13 }
 0x3e6   : > { %v1371_v38 = vmul.f32 0.5, %v1370_v15  ;;  %1191 = vst.msk [vmem:[%s2335_s19 + $0x68] sm:$0xff] %vm514_vm0, %v2584_v13 }
 0x3e7   : > { %1444 = vst.msk [vmem:[%s2352_s23 + $0x50] sm:$0xff] %vm514_vm0, %v1428_v32  ;;  %v1239_v40 = vadd.f32 %v1223_v34, %v1207_v18 }
 0x3e8   : > { %1476 = vst.msk [vmem:[%s2358_s27 + $0x50] sm:$0xff] %vm514_vm0, %v1460_v16  ;;  %v1372_v62 = vsub.f32 1.5, %v1371_v38 }
 0x3e9   : > { %v1896_v23 = vpop.eup %1895  ;;  %v1255_v25 = vmax.f32 %v1239_v40, 1e-12 }
 0x3ea   : > { %v1373_v42 = vmul.f32 %v1894_v2, %v1372_v62  ;;  %v1379_v47 = vmul.f32 %v1896_v23, %v1254_v21  ;;  %v1087_v28 = vpop.f32.mrf.mxu2  ;;  %v1157_v43 = vpop.f32.mrf.mxu3  ;;  %vm1385_vm7 = vweird.f32 %v1896_v23 }
 0x3eb   : > { %1897 = vrsqrt.f32 %v1255_v25  ;;  %v2603_v6 = vadd.f32 %v2317_v55, %v1087_v28  ;;  %v2606_v49 = vadd.f32 %v2322_v60, %v1157_v43  ;;  %vm1386_vm9 = vmor %vm1384_vm8, %vm1385_vm7  ;;  %vm1394_vm11 = vweird.f32 %v1255_v25 }
 0x3ec   : > { %v1377_v29 = vsel %vm1376_vm6, %v1894_v2, %v1373_v42  ;;  %v1380_v30 = vmul.f32 %v1896_v23, %v1379_v47 }
 0x3ed   : > { %v1429_v3 = vmul.f32 %v1377_v29, %v2537_v39  ;;  %v1461_v51 = vmul.f32 %v1377_v29, %v2540_v41  ;;  %1176 = vst.msk [vmem:[%s2328_s17 + $0x70] sm:$0xff] %vm514_vm0, %v2603_v6  ;;  %v1208_v5 = vmul.f32 %v2603_v6, %v2603_v6  ;;  %v1224_v35 = vmul.f32 %v2606_v49, %v2606_v49 }
 0x3ee   : > { %v1381_v52 = vmul.f32 0.5, %v1380_v30  ;;  %1192 = vst.msk [vmem:[%s2335_s19 + $0x70] sm:$0xff] %vm514_vm0, %v2606_v49 }
 0x3ef   : > { %1445 = vst.msk [vmem:[%s2352_s23 + $0x58] sm:$0xff] %vm514_vm0, %v1429_v3  ;;  %v1240_v36 = vadd.f32 %v1224_v35, %v1208_v5 }
 0x3f0   : > { %1477 = vst.msk [vmem:[%s2358_s27 + $0x58] sm:$0xff] %vm514_vm0, %v1461_v51  ;;  %v1382_v37 = vsub.f32 1.5, %v1381_v52 }
 0x3f1   : > { %v1898_v39 = vpop.eup %1897  ;;  %v1256_v41 = vmax.f32 %v1240_v36, 1e-12 }
 0x3f2   : > { %v1383_v12 = vmul.f32 %v1896_v23, %v1382_v37  ;;  %v1389_v59 = vmul.f32 %v1898_v39, %v1255_v25  ;;  %v1089_v44 = vpop.f32.mrf.mxu2  ;;  %v1159_v61 = vpop.f32.mrf.mxu3  ;;  %vm1395_vm10 = vweird.f32 %v1898_v39 }
 0x3f3   : > { %1899 = vrsqrt.f32 %v1256_v41  ;;  %v1090_v45 = vadd.f32 %v2317_v55, %v1089_v44  ;;  %v1160_v46 = vadd.f32 %v2322_v60, %v1159_v61  ;;  %vm1396_vm12 = vmor %vm1394_vm11, %vm1395_vm10  ;;  %vm1404_vm14 = vweird.f32 %v1256_v41 }
 0x3f4   : > { %v1387_v27 = vsel %vm1386_vm9, %v1896_v23, %v1383_v12  ;;  %v1390_v48 = vmul.f32 %v1898_v39, %v1389_v59 }
 0x3f5   : > { %v1430_v50 = vmul.f32 %v1387_v27, %v2559_v10  ;;  %v1462_v8 = vmul.f32 %v1387_v27, %v2562_v56  ;;  %1177 = vst.msk [vmem:[%s2328_s17 + $0x78] sm:$0xff] %vm514_vm0, %v1090_v45  ;;  %v1209_v17 = vmul.f32 %v1090_v45, %v1090_v45  ;;  %v1225_v19 = vmul.f32 %v1160_v46, %v1160_v46 }
 0x3f6   : > { %v1391_v54 = vmul.f32 0.5, %v1390_v48  ;;  %1193 = vst.msk [vmem:[%s2335_s19 + $0x78] sm:$0xff] %vm514_vm0, %v1160_v46 }
 0x3f7   : > { %1446 = vst.msk [vmem:[%s2352_s23 + $0x60] sm:$0xff] %vm514_vm0, %v1430_v50  ;;  %v1241_v53 = vadd.f32 %v1225_v19, %v1209_v17 }
 0x3f8   : > { %1478 = vst.msk [vmem:[%s2358_s27 + $0x60] sm:$0xff] %vm514_vm0, %v1462_v8  ;;  %v1392_v55 = vsub.f32 1.5, %v1391_v54 }
 0x3f9   : > { %v1900_v60 = vpop.eup %1899  ;;  %v1257_v20 = vmax.f32 %v1241_v53, 1e-12 }
 0x3fa   : > { %v1393_v10 = vmul.f32 %v1898_v39, %v1392_v55  ;;  %v1399_v56 = vmul.f32 %v1900_v60, %v1256_v41  ;;  %vm1405_vm13 = vweird.f32 %v1900_v60 }
 0x3fb   : > { %1901 = vrsqrt.f32 %v1257_v20  ;;  %vm1406_vm15 = vmor %vm1404_vm14, %vm1405_vm13  ;;  %vm1414_vm2 = vweird.f32 %v1257_v20 }
 0x3fc   : > { %v1397_v57 = vsel %vm1396_vm12, %v1898_v39, %v1393_v10  ;;  %v1400_v9 = vmul.f32 %v1900_v60, %v1399_v56 }
 0x3fd   : > { %v1431_v24 = vmul.f32 %v1397_v57, %v2581_v33  ;;  %v1463_v58 = vmul.f32 %v1397_v57, %v2584_v13 }
 0x3fe   : > { %v1401_v11 = vmul.f32 0.5, %v1400_v9 }
 0x3ff   : > { %1447 = vst.msk [vmem:[%s2352_s23 + $0x68] sm:$0xff] %vm514_vm0, %v1431_v24 }
 0x400   : > { %1479 = vst.msk [vmem:[%s2358_s27 + $0x68] sm:$0xff] %vm514_vm0, %v1463_v58  ;;  %v1402_v26 = vsub.f32 1.5, %v1401_v11 }
 0x401   : > { %v1902_v63 = vpop.eup %1901 }
 0x402   : > { %v1403_v0 = vmul.f32 %v1900_v60, %v1402_v26  ;;  %v1409_v1 = vmul.f32 %v1902_v63, %v1257_v20  ;;  %vm1415_vm1 = vweird.f32 %v1902_v63 }
 0x403   : > { %vm1416_vm3 = vmor %vm1414_vm2, %vm1415_vm1 }
 0x404   : > { %v1407_v2 = vsel %vm1406_vm15, %v1900_v60, %v1403_v0  ;;  %v1410_v21 = vmul.f32 %v1902_v63, %v1409_v1 }
 0x405   : > { %v1432_v4 = vmul.f32 %v1407_v2, %v2603_v6  ;;  %v1464_v7 = vmul.f32 %v1407_v2, %v2606_v49 }
 0x406   : > { %v1411_v22 = vmul.f32 0.5, %v1410_v21 }
 0x407   : > { %1448 = vst.msk [vmem:[%s2352_s23 + $0x70] sm:$0xff] %vm514_vm0, %v1432_v4 }
 0x408   : > { %1480 = vst.msk [vmem:[%s2358_s27 + $0x70] sm:$0xff] %vm514_vm0, %v1464_v7  ;;  %v1412_v31 = vsub.f32 1.5, %v1411_v22 }
 0x40a   : > { %v1413_v33 = vmul.f32 %v1902_v63, %v1412_v31 }
 0x40c   : > { %v1417_v13 = vsel %vm1416_vm3, %v1902_v63, %v1413_v33 }
 0x40d   : > { %v1433_v14 = vmul.f32 %v1417_v13, %v1090_v45  ;;  %v1465_v15 = vmul.f32 %v1417_v13, %v1160_v46 }
 0x40f   : > { %1449 = vst.msk [vmem:[%s2352_s23 + $0x78] sm:$0xff] %vm514_vm0, %v1433_v14 }
 0x410   : > { %1481 = vst.msk [vmem:[%s2358_s27 + $0x78] sm:$0xff] %vm514_vm0, %v1465_v15 }
 0x411 PF: > { %s17_s21 = sadd.s32 1, %s1909_s21  }
 0x412   : > { %p14_p4 = scmp.ge.s32.totalorder %s17_s21, 4  }
 0x414   :  { %16 = sbr.rel (!%p14_p4) target bundleno = 1 (0x1), region = 104 }

</bundles_post_ra>
